<compile_context>
chip_gen: v5e
topology: v5e:2x2
jax: 0.10.0
libtpu: 0.0.40
codegen_flags: <defaults>
</compile_context>

<pallas_src>
import jax
import jax.numpy as jnp
from jax.experimental import pallas as pl
from jax.experimental.pallas import tpu as pltpu


DATA_DIM = 784  # fixed by x.view(-1, 784) in forward()


def _round_up(n, m):
    return ((n + m - 1) // m) * m


def _softplus(t):
    # numerically stable softplus, pure VPU/EUP elementwise ops (f32)
    return jnp.maximum(t, 0.0) + jnp.log1p(jnp.exp(-jnp.abs(t)))


def _vae_kernel(
    x_ref, eps_ref,
    w1_ref, b1_ref, w2_ref, b2_ref, w34_ref, b34_ref,
    w5_ref, b5_ref, w6_ref, b6_ref, w7_ref, b7_ref,
    xmean_ref, lat_ref,
):
    l_pad = eps_ref.shape[-1]

    def linear(a, w_ref, b_ref):
        # bf16 operands feed the MXU at native rate; accumulate + bias in f32.
        return (
            jnp.dot(a.astype(w_ref.dtype), w_ref[...],
                    preferred_element_type=jnp.float32)
            + b_ref[...]
        )

    x = x_ref[...]
    eps = eps_ref[...]

    # ---- encoder ----
    h1 = jnp.tanh(linear(x, w1_ref, b1_ref))
    h2 = _softplus(linear(h1, w2_ref, b2_ref))

    # fused mean/logvar heads: single (H_PAD, 2*L_PAD) matmul, split by lane.
    mv = linear(h2, w34_ref, b34_ref)
    mean = mv[:, :l_pad]
    logvar = jnp.clip(mv[:, l_pad:], -4.5, 0.0)      # nn.Hardtanh(-4.5, 0)

    # ---- reparameterize (Gaussian, f32 path) ----
    std = jnp.exp(logvar * 0.5)
    z = mean + eps * std

    # ---- decoder ----
    d1 = jnp.tanh(linear(z, w5_ref, b5_ref))
    d2 = _softplus(linear(d1, w6_ref, b6_ref))
    logits = linear(d2, w7_ref, b7_ref)
    x_mean = pl.reciprocal(1.0 + jnp.exp(-logits), approx=True)   # sigmoid

    # lane-dense stores: x_mean slab (TB, D_PAD), latent slab [z|mean|logvar]
    xmean_ref[...] = x_mean.astype(xmean_ref.dtype)
    lat_ref[:, :l_pad] = z
    lat_ref[:, l_pad:2 * l_pad] = mean
    lat_ref[:, 2 * l_pad:] = logvar


def vae_forward(x, eps, params):
    """x: (N, ...) flattened to (N, 784); eps: (N, latent_dim); params: dict."""
    B = x.shape[0]
    x2d = x.reshape(B, -1).astype(jnp.float32)
    D = x2d.shape[1]
    assert D == DATA_DIM, "forward() hard-codes view(-1, 784)"
    H = params["w1"].shape[1]
    L = params["w3"].shape[1]

    f32, bf16 = jnp.float32, jnp.bfloat16

    # lane-aligned padded dims
    D_PAD = _round_up(D, 128)       # 784 -> 896
    H_PAD = _round_up(H, 128)
    L_PAD = _round_up(L, 128)

    # batch tiling: whole (tiny) batch, or 256-row tiles for realistic batches
    TB = min(256, _round_up(B, 8))
    B_PAD = _round_up(B, TB)
    n_tiles = B_PAD // TB

    def pad2(a, r, c):
        return jnp.pad(a, ((0, r - a.shape[0]), (0, c - a.shape[1])))

    # bf16 activations/weights (halve HBM traffic), f32 biases (f32 acc add)
    xp = pad2(x2d, B_PAD, D_PAD).astype(bf16)
    epsp = pad2(eps.astype(f32), B_PAD, L_PAD)

    w1 = pad2(params["w1"], D_PAD, H_PAD).astype(bf16)
    b1 = pad2(params["b1"], 1, H_PAD).astype(f32)
    w2 = pad2(params["w2"], H_PAD, H_PAD).astype(bf16)
    b2 = pad2(params["b2"], 1, H_PAD).astype(f32)
    w34 = jnp.zeros((H_PAD, 2 * L_PAD), f32)
    w34 = w34.at[:H, :L].set(params["w3"]).at[:H, L_PAD:L_PAD + L].set(params["w4"])
    w34 = w34.astype(bf16)
    b34 = jnp.zeros((1, 2 * L_PAD), f32)
    b34 = b34.at[:, :L].set(params["b3"]).at[:, L_PAD:L_PAD + L].set(params["b4"])
    w5 = pad2(params["w5"], L_PAD, H_PAD).astype(bf16)
    b5 = pad2(params["b5"], 1, H_PAD).astype(f32)
    w6 = pad2(params["w6"], H_PAD, H_PAD).astype(bf16)
    b6 = pad2(params["b6"], 1, H_PAD).astype(f32)
    w7 = pad2(params["w7"], H_PAD, D_PAD).astype(bf16)
    b7 = pad2(params["b7"], 1, D_PAD).astype(f32)

    args = (xp, epsp, w1, b1, w2, b2, w34, b34, w5, b5, w6, b6, w7, b7)

    def resident(shape):
        # weights/biases: same block every grid step -> stay VMEM-resident
        return pl.BlockSpec(shape, lambda i: (0,) * len(shape))

    in_specs = [
        pl.BlockSpec((TB, D_PAD), lambda i: (i, 0)),       # x batch tile
        pl.BlockSpec((TB, L_PAD), lambda i: (i, 0)),       # eps batch tile
    ] + [resident(a.shape) for a in args[2:]]

    out_shapes = (
        jax.ShapeDtypeStruct((B_PAD, D_PAD), bf16),        # x_mean slab
        jax.ShapeDtypeStruct((B_PAD, 3 * L_PAD), f32),     # [z | mean | logvar]
    )
    out_specs = (
        pl.BlockSpec((TB, D_PAD), lambda i: (i, 0)),
        pl.BlockSpec((TB, 3 * L_PAD), lambda i: (i, 0)),
    )

    xmean_slab, lat_slab = pl.pallas_call(
        _vae_kernel,
        grid=(n_tiles,),
        in_specs=in_specs,
        out_specs=out_specs,
        out_shape=out_shapes,
        compiler_params=pltpu.CompilerParams(
            dimension_semantics=("parallel",),
        ),
    )(*args)

    x_mean = xmean_slab[:B, :D].astype(f32)
    z = lat_slab[:B, :L]
    mean = lat_slab[:B, L_PAD:L_PAD + L]
    logvar = lat_slab[:B, 2 * L_PAD:2 * L_PAD + L]
    return x_mean, z, (mean, logvar)


def init_params(key, data_dim, hidden_dim, latent_dim):
    """Deterministic synthetic init (torch nn.Linear-style uniform bounds)."""
    names_shapes = [
        ("w1", (data_dim, hidden_dim)), ("b1", (1, hidden_dim)),
        ("w2", (hidden_dim, hidden_dim)), ("b2", (1, hidden_dim)),
        ("w3", (hidden_dim, latent_dim)), ("b3", (1, latent_dim)),
        ("w4", (hidden_dim, latent_dim)), ("b4", (1, latent_dim)),
        ("w5", (latent_dim, hidden_dim)), ("b5", (1, hidden_dim)),
        ("w6", (hidden_dim, hidden_dim)), ("b6", (1, hidden_dim)),
        ("w7", (hidden_dim, data_dim)), ("b7", (1, data_dim)),
    ]
    params = {}
    keys = jax.random.split(key, len(names_shapes))
    for k, (name, shape) in zip(keys, names_shapes):
        fan_in = shape[0] if name.startswith("w") else shape[1]
        bound = 1.0 / jnp.sqrt(jnp.float32(fan_in))
        params[name] = jax.random.uniform(
            k, shape, dtype=jnp.float32, minval=-bound, maxval=bound
        )
    return params


def reference_forward(x, eps, params):
    """Pure-JAX f32 reference for correctness check."""
    x2d = x.reshape(x.shape[0], -1)
    h1 = jnp.tanh(x2d @ params["w1"] + params["b1"])
    h2 = jax.nn.softplus(h1 @ params["w2"] + params["b2"])
    mean = h2 @ params["w3"] + params["b3"]
    logvar = jnp.clip(h2 @ params["w4"] + params["b4"], -4.5, 0.0)
    z = mean + eps * jnp.exp(logvar * 0.5)
    d1 = jnp.tanh(z @ params["w5"] + params["b5"])
    d2 = jax.nn.softplus(d1 @ params["w6"] + params["b6"])
    x_mean = jax.nn.sigmoid(d2 @ params["w7"] + params["b7"])
    return x_mean, z, (mean, logvar)


if __name__ == "__main__":
    HIDDEN_DIM = 64
    LATENT_DIM = 16
    BATCH = 8

    key = jax.random.PRNGKey(0)
    k_params, k_x, k_eps = jax.random.split(key, 3)

    params = init_params(k_params, DATA_DIM, HIDDEN_DIM, LATENT_DIM)
    # input images, NCHW like the torch module would receive (N, 1, 28, 28)
    x = jax.random.uniform(k_x, (BATCH, 1, 28, 28), dtype=jnp.float32)
    # reparameterization noise (torch uses .normal_(); we pass it explicitly)
    eps = jax.random.normal(k_eps, (BATCH, LATENT_DIM), dtype=jnp.float32)

    x_mean, z, (mean, logvar) = vae_forward(x, eps, params)
    jax.block_until_ready((x_mean, z, mean, logvar))

    # correctness: compare against the pure-JAX reference evaluated on the
    # same bf16-rounded weights/inputs the kernel consumes (f32 math elsewhere)
    params_q = {
        k: (v.astype(jnp.bfloat16).astype(jnp.float32) if k.startswith("w") else v)
        for k, v in params.items()
    }
    x_q = x.astype(jnp.bfloat16).astype(jnp.float32)
    r_xm, r_z, (r_mean, r_logvar) = reference_forward(x_q, eps, params_q)

    assert jnp.allclose(x_mean, r_xm, atol=2e-2, rtol=2e-2), "x_mean mismatch"
    assert jnp.allclose(z, r_z, atol=2e-2, rtol=2e-2), "z mismatch"
    assert jnp.allclose(mean, r_mean, atol=2e-2, rtol=2e-2), "mean mismatch"
    assert jnp.allclose(logvar, r_logvar, atol=2e-2, rtol=2e-2), "logvar mismatch"

    print("KERNEL_OK")
</pallas_src>

<mosaic_0001>
module attributes {stable_mosaic.version = 11 : i64} {
  func.func @_vae_kernel(%arg0: i32, %arg1: memref<8x896xbf16, #tpu.memory_space<vmem>>, %arg2: memref<8x128xf32, #tpu.memory_space<vmem>>, %arg3: memref<896x128xbf16, #tpu.memory_space<vmem>>, %arg4: memref<1x128xf32, #tpu.memory_space<vmem>>, %arg5: memref<128x128xbf16, #tpu.memory_space<vmem>>, %arg6: memref<1x128xf32, #tpu.memory_space<vmem>>, %arg7: memref<128x256xbf16, #tpu.memory_space<vmem>>, %arg8: memref<1x256xf32, #tpu.memory_space<vmem>>, %arg9: memref<128x128xbf16, #tpu.memory_space<vmem>>, %arg10: memref<1x128xf32, #tpu.memory_space<vmem>>, %arg11: memref<128x128xbf16, #tpu.memory_space<vmem>>, %arg12: memref<1x128xf32, #tpu.memory_space<vmem>>, %arg13: memref<128x896xbf16, #tpu.memory_space<vmem>>, %arg14: memref<1x896xf32, #tpu.memory_space<vmem>>, %arg15: memref<8x896xbf16, #tpu.memory_space<vmem>>, %arg16: memref<8x384xf32, #tpu.memory_space<vmem>>) attributes {dimension_semantics = [#tpu.dimension_semantics<parallel>], iteration_bounds = array<i64: 1>, scalar_prefetch = 0 : i64, scratch_operands = 0 : i64, tpu.core_type = #tpu.core_type<tc>, window_params = [{transform_indices = @transform_0, window_bounds = array<i64: 8, 896>}, {transform_indices = @transform_1, window_bounds = array<i64: 8, 128>}, {pipeline_mode = #tpu.pipeline_mode<synchronous>, transform_indices = @transform_2, window_bounds = array<i64: 896, 128>}, {pipeline_mode = #tpu.pipeline_mode<synchronous>, transform_indices = @transform_3, window_bounds = array<i64: 1, 128>}, {pipeline_mode = #tpu.pipeline_mode<synchronous>, transform_indices = @transform_4, window_bounds = array<i64: 128, 128>}, {pipeline_mode = #tpu.pipeline_mode<synchronous>, transform_indices = @transform_5, window_bounds = array<i64: 1, 128>}, {pipeline_mode = #tpu.pipeline_mode<synchronous>, transform_indices = @transform_6, window_bounds = array<i64: 128, 256>}, {pipeline_mode = #tpu.pipeline_mode<synchronous>, transform_indices = @transform_7, window_bounds = array<i64: 1, 256>}, {pipeline_mode = #tpu.pipeline_mode<synchronous>, transform_indices = @transform_8, window_bounds = array<i64: 128, 128>}, {pipeline_mode = #tpu.pipeline_mode<synchronous>, transform_indices = @transform_9, window_bounds = array<i64: 1, 128>}, {pipeline_mode = #tpu.pipeline_mode<synchronous>, transform_indices = @transform_10, window_bounds = array<i64: 128, 128>}, {pipeline_mode = #tpu.pipeline_mode<synchronous>, transform_indices = @transform_11, window_bounds = array<i64: 1, 128>}, {pipeline_mode = #tpu.pipeline_mode<synchronous>, transform_indices = @transform_12, window_bounds = array<i64: 128, 896>}, {pipeline_mode = #tpu.pipeline_mode<synchronous>, transform_indices = @transform_13, window_bounds = array<i64: 1, 896>}, {transform_indices = @transform_14, window_bounds = array<i64: 8, 896>}, {transform_indices = @transform_15, window_bounds = array<i64: 8, 384>}]} {
    %c0 = arith.constant 0 : index
    %c0_0 = arith.constant 0 : index
    %0 = vector.load %arg1[%c0, %c0_0] : memref<8x896xbf16, #tpu.memory_space<vmem>>, vector<8x896xbf16>
    %c0_1 = arith.constant 0 : index
    %c0_2 = arith.constant 0 : index
    %1 = vector.load %arg2[%c0_1, %c0_2] : memref<8x128xf32, #tpu.memory_space<vmem>>, vector<8x128xf32>
    %c0_3 = arith.constant 0 : index
    %c0_4 = arith.constant 0 : index
    %2 = vector.load %arg3[%c0_3, %c0_4] : memref<896x128xbf16, #tpu.memory_space<vmem>>, vector<896x128xbf16>
    %cst = arith.constant dense<0.000000e+00> : vector<8x128xf32>
    %3 = tpu.matmul %0, %2, %cst {dimension_numbers = #tpu.dot_dimension_numbers<[1], [0], [0], [1], [0, 0, 1, 1], [], []>} : vector<8x896xbf16>, vector<896x128xbf16>, vector<8x128xf32> -> vector<8x128xf32>
    %c0_5 = arith.constant 0 : index
    %c0_6 = arith.constant 0 : index
    %4 = vector.load %arg4[%c0_5, %c0_6] : memref<1x128xf32, #tpu.memory_space<vmem>>, vector<1x128xf32>
    %5 = vector.broadcast %4 : vector<1x128xf32> to vector<8x128xf32>
    %6 = arith.addf %3, %5 : vector<8x128xf32>
    %7 = math.tanh %6 : vector<8x128xf32>
    %8 = arith.truncf %7 : vector<8x128xf32> to vector<8x128xbf16>
    %c0_7 = arith.constant 0 : index
    %c0_8 = arith.constant 0 : index
    %9 = vector.load %arg5[%c0_7, %c0_8] : memref<128x128xbf16, #tpu.memory_space<vmem>>, vector<128x128xbf16>
    %cst_9 = arith.constant dense<0.000000e+00> : vector<8x128xf32>
    %10 = tpu.matmul %8, %9, %cst_9 {dimension_numbers = #tpu.dot_dimension_numbers<[1], [0], [0], [1], [0, 0, 1, 1], [], []>} : vector<8x128xbf16>, vector<128x128xbf16>, vector<8x128xf32> -> vector<8x128xf32>
    %c0_10 = arith.constant 0 : index
    %c0_11 = arith.constant 0 : index
    %11 = vector.load %arg6[%c0_10, %c0_11] : memref<1x128xf32, #tpu.memory_space<vmem>>, vector<1x128xf32>
    %12 = vector.broadcast %11 : vector<1x128xf32> to vector<8x128xf32>
    %13 = arith.addf %10, %12 : vector<8x128xf32>
    %cst_12 = arith.constant 0.000000e+00 : f32
    %14 = vector.broadcast %cst_12 : f32 to vector<8x128xf32>
    %15 = arith.maximumf %13, %14 : vector<8x128xf32>
    %16 = math.absf %13 : vector<8x128xf32>
    %cst_13 = arith.constant 0.000000e+00 : f32
    %17 = vector.broadcast %cst_13 : f32 to vector<8x128xf32>
    %18 = arith.subf %17, %16 : vector<8x128xf32>
    %19 = math.exp %18 : vector<8x128xf32>
    %20 = math.log1p %19 : vector<8x128xf32>
    %21 = arith.addf %15, %20 : vector<8x128xf32>
    %22 = arith.truncf %21 : vector<8x128xf32> to vector<8x128xbf16>
    %c0_14 = arith.constant 0 : index
    %c0_15 = arith.constant 0 : index
    %23 = vector.load %arg7[%c0_14, %c0_15] : memref<128x256xbf16, #tpu.memory_space<vmem>>, vector<128x256xbf16>
    %cst_16 = arith.constant dense<0.000000e+00> : vector<8x256xf32>
    %24 = tpu.matmul %22, %23, %cst_16 {dimension_numbers = #tpu.dot_dimension_numbers<[1], [0], [0], [1], [0, 0, 1, 1], [], []>} : vector<8x128xbf16>, vector<128x256xbf16>, vector<8x256xf32> -> vector<8x256xf32>
    %c0_17 = arith.constant 0 : index
    %c0_18 = arith.constant 0 : index
    %25 = vector.load %arg8[%c0_17, %c0_18] : memref<1x256xf32, #tpu.memory_space<vmem>>, vector<1x256xf32>
    %26 = vector.broadcast %25 : vector<1x256xf32> to vector<8x256xf32>
    %27 = arith.addf %24, %26 : vector<8x256xf32>
    %28 = vector.extract_strided_slice %27 {offsets = [0, 0], sizes = [8, 128], strides = [1, 1]} : vector<8x256xf32> to vector<8x128xf32>
    %29 = vector.extract_strided_slice %27 {offsets = [0, 128], sizes = [8, 128], strides = [1, 1]} : vector<8x256xf32> to vector<8x128xf32>
    %cst_19 = arith.constant -4.500000e+00 : f32
    %cst_20 = arith.constant 0.000000e+00 : f32
    %30 = vector.broadcast %cst_19 : f32 to vector<8x128xf32>
    %31 = arith.maximumf %30, %29 : vector<8x128xf32>
    %32 = vector.broadcast %cst_20 : f32 to vector<8x128xf32>
    %33 = arith.minimumf %32, %31 : vector<8x128xf32>
    %cst_21 = arith.constant 5.000000e-01 : f32
    %34 = vector.broadcast %cst_21 : f32 to vector<8x128xf32>
    %35 = arith.mulf %33, %34 : vector<8x128xf32>
    %36 = math.exp %35 : vector<8x128xf32>
    %37 = arith.mulf %1, %36 : vector<8x128xf32>
    %38 = arith.addf %28, %37 : vector<8x128xf32>
    %39 = arith.truncf %38 : vector<8x128xf32> to vector<8x128xbf16>
    %c0_22 = arith.constant 0 : index
    %c0_23 = arith.constant 0 : index
    %40 = vector.load %arg9[%c0_22, %c0_23] : memref<128x128xbf16, #tpu.memory_space<vmem>>, vector<128x128xbf16>
    %cst_24 = arith.constant dense<0.000000e+00> : vector<8x128xf32>
    %41 = tpu.matmul %39, %40, %cst_24 {dimension_numbers = #tpu.dot_dimension_numbers<[1], [0], [0], [1], [0, 0, 1, 1], [], []>} : vector<8x128xbf16>, vector<128x128xbf16>, vector<8x128xf32> -> vector<8x128xf32>
    %c0_25 = arith.constant 0 : index
    %c0_26 = arith.constant 0 : index
    %42 = vector.load %arg10[%c0_25, %c0_26] : memref<1x128xf32, #tpu.memory_space<vmem>>, vector<1x128xf32>
    %43 = vector.broadcast %42 : vector<1x128xf32> to vector<8x128xf32>
    %44 = arith.addf %41, %43 : vector<8x128xf32>
    %45 = math.tanh %44 : vector<8x128xf32>
    %46 = arith.truncf %45 : vector<8x128xf32> to vector<8x128xbf16>
    %c0_27 = arith.constant 0 : index
    %c0_28 = arith.constant 0 : index
    %47 = vector.load %arg11[%c0_27, %c0_28] : memref<128x128xbf16, #tpu.memory_space<vmem>>, vector<128x128xbf16>
    %cst_29 = arith.constant dense<0.000000e+00> : vector<8x128xf32>
    %48 = tpu.matmul %46, %47, %cst_29 {dimension_numbers = #tpu.dot_dimension_numbers<[1], [0], [0], [1], [0, 0, 1, 1], [], []>} : vector<8x128xbf16>, vector<128x128xbf16>, vector<8x128xf32> -> vector<8x128xf32>
    %c0_30 = arith.constant 0 : index
    %c0_31 = arith.constant 0 : index
    %49 = vector.load %arg12[%c0_30, %c0_31] : memref<1x128xf32, #tpu.memory_space<vmem>>, vector<1x128xf32>
    %50 = vector.broadcast %49 : vector<1x128xf32> to vector<8x128xf32>
    %51 = arith.addf %48, %50 : vector<8x128xf32>
    %cst_32 = arith.constant 0.000000e+00 : f32
    %52 = vector.broadcast %cst_32 : f32 to vector<8x128xf32>
    %53 = arith.maximumf %51, %52 : vector<8x128xf32>
    %54 = math.absf %51 : vector<8x128xf32>
    %cst_33 = arith.constant 0.000000e+00 : f32
    %55 = vector.broadcast %cst_33 : f32 to vector<8x128xf32>
    %56 = arith.subf %55, %54 : vector<8x128xf32>
    %57 = math.exp %56 : vector<8x128xf32>
    %58 = math.log1p %57 : vector<8x128xf32>
    %59 = arith.addf %53, %58 : vector<8x128xf32>
    %60 = arith.truncf %59 : vector<8x128xf32> to vector<8x128xbf16>
    %c0_34 = arith.constant 0 : index
    %c0_35 = arith.constant 0 : index
    %61 = vector.load %arg13[%c0_34, %c0_35] : memref<128x896xbf16, #tpu.memory_space<vmem>>, vector<128x896xbf16>
    %cst_36 = arith.constant dense<0.000000e+00> : vector<8x896xf32>
    %62 = tpu.matmul %60, %61, %cst_36 {dimension_numbers = #tpu.dot_dimension_numbers<[1], [0], [0], [1], [0, 0, 1, 1], [], []>} : vector<8x128xbf16>, vector<128x896xbf16>, vector<8x896xf32> -> vector<8x896xf32>
    %c0_37 = arith.constant 0 : index
    %c0_38 = arith.constant 0 : index
    %63 = vector.load %arg14[%c0_37, %c0_38] : memref<1x896xf32, #tpu.memory_space<vmem>>, vector<1x896xf32>
    %64 = vector.broadcast %63 : vector<1x896xf32> to vector<8x896xf32>
    %65 = arith.addf %62, %64 : vector<8x896xf32>
    %cst_39 = arith.constant 0.000000e+00 : f32
    %66 = vector.broadcast %cst_39 : f32 to vector<8x896xf32>
    %67 = arith.subf %66, %65 : vector<8x896xf32>
    %68 = math.exp %67 : vector<8x896xf32>
    %cst_40 = arith.constant 1.000000e+00 : f32
    %69 = vector.broadcast %cst_40 : f32 to vector<8x896xf32>
    %70 = arith.addf %69, %68 : vector<8x896xf32>
    %71 = tpu.reciprocal %70 {approx = true} : vector<8x896xf32> -> vector<8x896xf32>
    %72 = arith.truncf %71 : vector<8x896xf32> to vector<8x896xbf16>
    %c0_41 = arith.constant 0 : index
    %c0_42 = arith.constant 0 : index
    %73 = vector.load %arg15[%c0_41, %c0_42] : memref<8x896xbf16, #tpu.memory_space<vmem>>, vector<8x896xbf16>
    tpu.vector_store %arg15[%c0_41, %c0_42], %72 {strides = array<i32>} : memref<8x896xbf16, #tpu.memory_space<vmem>>, vector<8x896xbf16>,
    %c0_43 = arith.constant 0 : index
    %c0_44 = arith.constant 0 : index
    %74 = vector.load %arg16[%c0_43, %c0_44] : memref<8x384xf32, #tpu.memory_space<vmem>>, vector<8x128xf32>
    tpu.vector_store %arg16[%c0_43, %c0_44], %38 {strides = array<i32>} : memref<8x384xf32, #tpu.memory_space<vmem>>, vector<8x128xf32>,
    %c0_45 = arith.constant 0 : index
    %c128 = arith.constant 128 : index
    %75 = vector.load %arg16[%c0_45, %c128] : memref<8x384xf32, #tpu.memory_space<vmem>>, vector<8x128xf32>
    tpu.vector_store %arg16[%c0_45, %c128], %28 {strides = array<i32>} : memref<8x384xf32, #tpu.memory_space<vmem>>, vector<8x128xf32>,
    %c0_46 = arith.constant 0 : index
    %c256 = arith.constant 256 : index
    %76 = vector.load %arg16[%c0_46, %c256] : memref<8x384xf32, #tpu.memory_space<vmem>>, vector<8x128xf32>
    tpu.vector_store %arg16[%c0_46, %c256], %33 {strides = array<i32>} : memref<8x384xf32, #tpu.memory_space<vmem>>, vector<8x128xf32>,
    return
  }
  func.func @transform_0(%arg0: i32) -> (i32, i32) {
    %c0_i32 = arith.constant 0 : i32
    %c0_i32_0 = arith.constant 0 : i32
    return %arg0, %c0_i32 : i32, i32
  }
  func.func @transform_1(%arg0: i32) -> (i32, i32) {
    %c0_i32 = arith.constant 0 : i32
    %c0_i32_0 = arith.constant 0 : i32
    return %arg0, %c0_i32 : i32, i32
  }
  func.func @transform_2(%arg0: i32) -> (i32, i32) {
    %c0_i32 = arith.constant 0 : i32
    %c0_i32_0 = arith.constant 0 : i32
    %c0_i32_1 = arith.constant 0 : i32
    return %c0_i32, %c0_i32_0 : i32, i32
  }
  func.func @transform_3(%arg0: i32) -> (i32, i32) {
    %c0_i32 = arith.constant 0 : i32
    %c0_i32_0 = arith.constant 0 : i32
    %c0_i32_1 = arith.constant 0 : i32
    return %c0_i32, %c0_i32_0 : i32, i32
  }
  func.func @transform_4(%arg0: i32) -> (i32, i32) {
    %c0_i32 = arith.constant 0 : i32
    %c0_i32_0 = arith.constant 0 : i32
    %c0_i32_1 = arith.constant 0 : i32
    return %c0_i32, %c0_i32_0 : i32, i32
  }
  func.func @transform_5(%arg0: i32) -> (i32, i32) {
    %c0_i32 = arith.constant 0 : i32
    %c0_i32_0 = arith.constant 0 : i32
    %c0_i32_1 = arith.constant 0 : i32
    return %c0_i32, %c0_i32_0 : i32, i32
  }
  func.func @transform_6(%arg0: i32) -> (i32, i32) {
    %c0_i32 = arith.constant 0 : i32
    %c0_i32_0 = arith.constant 0 : i32
    %c0_i32_1 = arith.constant 0 : i32
    return %c0_i32, %c0_i32_0 : i32, i32
  }
  func.func @transform_7(%arg0: i32) -> (i32, i32) {
    %c0_i32 = arith.constant 0 : i32
    %c0_i32_0 = arith.constant 0 : i32
    %c0_i32_1 = arith.constant 0 : i32
    return %c0_i32, %c0_i32_0 : i32, i32
  }
  func.func @transform_8(%arg0: i32) -> (i32, i32) {
    %c0_i32 = arith.constant 0 : i32
    %c0_i32_0 = arith.constant 0 : i32
    %c0_i32_1 = arith.constant 0 : i32
    return %c0_i32, %c0_i32_0 : i32, i32
  }
  func.func @transform_9(%arg0: i32) -> (i32, i32) {
    %c0_i32 = arith.constant 0 : i32
    %c0_i32_0 = arith.constant 0 : i32
    %c0_i32_1 = arith.constant 0 : i32
    return %c0_i32, %c0_i32_0 : i32, i32
  }
  func.func @transform_10(%arg0: i32) -> (i32, i32) {
    %c0_i32 = arith.constant 0 : i32
    %c0_i32_0 = arith.constant 0 : i32
    %c0_i32_1 = arith.constant 0 : i32
    return %c0_i32, %c0_i32_0 : i32, i32
  }
  func.func @transform_11(%arg0: i32) -> (i32, i32) {
    %c0_i32 = arith.constant 0 : i32
    %c0_i32_0 = arith.constant 0 : i32
    %c0_i32_1 = arith.constant 0 : i32
    return %c0_i32, %c0_i32_0 : i32, i32
  }
  func.func @transform_12(%arg0: i32) -> (i32, i32) {
    %c0_i32 = arith.constant 0 : i32
    %c0_i32_0 = arith.constant 0 : i32
    %c0_i32_1 = arith.constant 0 : i32
    return %c0_i32, %c0_i32_0 : i32, i32
  }
  func.func @transform_13(%arg0: i32) -> (i32, i32) {
    %c0_i32 = arith.constant 0 : i32
    %c0_i32_0 = arith.constant 0 : i32
    %c0_i32_1 = arith.constant 0 : i32
    return %c0_i32, %c0_i32_0 : i32, i32
  }
  func.func @transform_14(%arg0: i32) -> (i32, i32) {
    %c0_i32 = arith.constant 0 : i32
    %c0_i32_0 = arith.constant 0 : i32
    return %arg0, %c0_i32 : i32, i32
  }
  func.func @transform_15(%arg0: i32) -> (i32, i32) {
    %c0_i32 = arith.constant 0 : i32
    %c0_i32_0 = arith.constant 0 : i32
    return %arg0, %c0_i32 : i32, i32
  }
}

</mosaic_0001>

<bundles_post_ra>
// kernel: tpu_custom_call.1
= control target key start
LH: loop header
LB: loop body
LE: loop exit
PB: predicated region body
PF: predicated region fallthrough
CT: control target
= control target key end

     0   :  { %21 = vsyncpa [#allocation3], 0  ;;  %s2973_s0 = inlined_call_operand.hbm [shape: bf16[8,896], index: 0, kind: input, shape index: {}]   ;;  %s2974_s1 = inlined_call_operand.hbm [shape: f32[8,128], index: 1, kind: input, shape index: {}]   ;;  %s2975_s2 = inlined_call_operand.hbm [shape: bf16[896,128], index: 2, kind: input, shape index: {}]   ;;  %s2976_s3 = inlined_call_operand.vmem [shape: f32[1,128], index: 3, kind: input, shape index: {}]   ;;  %s2977_s4 = inlined_call_operand.hbm [shape: bf16[128,128], index: 4, kind: input, shape index: {}]   ;;  %s2978_s5 = inlined_call_operand.vmem [shape: f32[1,128], index: 5, kind: input, shape index: {}]   ;;  %s2979_s6 = inlined_call_operand.hbm [shape: bf16[128,256], index: 6, kind: input, shape index: {}]   ;;  %s2980_s7 = inlined_call_operand.vmem [shape: f32[1,256], index: 7, kind: input, shape index: {}]   ;;  %s2981_s8 = inlined_call_operand.hbm [shape: bf16[128,128], index: 8, kind: input, shape index: {}]   ;;  %s2982_s9 = inlined_call_operand.vmem [shape: f32[1,128], index: 9, kind: input, shape index: {}]   ;;  %s2983_s10 = inlined_call_operand.hbm [shape: bf16[128,128], index: 10, kind: input, shape index: {}]   ;;  %s2984_s11 = inlined_call_operand.hbm [shape: f32[1,128], index: 11, kind: input, shape index: {}]   ;;  %s2985_s12 = inlined_call_operand.hbm [shape: bf16[128,896], index: 12, kind: input, shape index: {}]   ;;  %s2986_s13 = inlined_call_operand.vmem [shape: f32[1,896], index: 13, kind: input, shape index: {}]   ;;  %s2987_s14 = inlined_call_operand.hbm [shape: bf16[8,896], index: 14, kind: output, shape index: {0}]   ;;  %s2988_s15 = inlined_call_operand.hbm [shape: f32[8,384], index: 15, kind: output, shape index: {1}]  }
   0x1   :  { %22 = vsyncpa [#allocation6], 0 }
   0x2   :  { %23 = vsyncpa [#allocation9], 0 }
   0x3   :  { %24 = vsyncpa [#allocation12], 0 }
   0x4   :  { %25 = vsyncpa [#allocation15], 0 }
   0x5   :  { %26 = vsyncpa [#allocation4], 0  ;;  %s44_s20 = sshll.u32 %s2974_s1, 4  ;;  %s45_s20 = int_to_ptr.hbm [resolvable:$true] %s44_s20 }
   0x6   :  { %27 = vsyncpa [#allocation19], 0  ;;  %s2816_s21 = smov [#allocation5]   ;;  %s69_s25 = sshll.u32 %s2977_s4, 4  ;;  %s70_s25 = int_to_ptr.hbm [resolvable:$true] %s69_s25 }
   0x7   :  { %s46_s22 = sshll.u32 %s2816_s21, 4  ;;  %s2817_s26 = smov [#allocation8]   ;;  %s47_s22 = int_to_ptr.vmem [resolvable:$true] %s46_s22 }
   0x8   :  { %49 = dma.hbm_to_vmem [thread:$0]  %s45_s20, 128, %s47_s22, [#allocation6]  }
   0x9   :  { %s71_s27 = sshll.u32 %s2817_s26, 4  ;;  %s99_s30 = sshll.u32 %s2981_s8, 4  ;;  %s72_s27 = int_to_ptr.vmem [resolvable:$true] %s71_s27  ;;  %s100_s30 = int_to_ptr.hbm [resolvable:$true] %s99_s30 }
   0xa   :  { %s2818_s1 = smov 64   ;;  %s2819_s16 = smov 4  }
   0xb   :  { %77 = dma.hbm_to_vmem [thread:$0]  %s70_s25, 1024, %s72_s27, [#allocation9], %s2818_s1, %s2818_s1, %s2819_s16  }
   0xc   :  { %s128_s19 = sshll.u32 %s2984_s11, 4  ;;  %s2820_s4 = smov [#allocation11]   ;;  %s129_s19 = int_to_ptr.hbm [resolvable:$true] %s128_s19 }
   0xd   :  { %s101_s20 = sshll.u32 %s2820_s4, 4  ;;  %s2821_s8 = smov [#allocation14]   ;;  %s102_s20 = int_to_ptr.vmem [resolvable:$true] %s101_s20 }
   0xe   :  { %107 = dma.hbm_to_vmem [thread:$0]  %s100_s30, 1024, %s102_s20, [#allocation12], %s2818_s1, %s2818_s1, %s2819_s16  }
   0xf   :  { %s130_s21 = sshll.u32 %s2821_s8, 4  ;;  %s33_s24 = sshll.u32 %s2973_s0, 4  ;;  %s131_s21 = int_to_ptr.vmem [resolvable:$true] %s130_s21  ;;  %s34_s24 = int_to_ptr.hbm [resolvable:$true] %s33_s24 }
  0x10   :  { %133 = dma.hbm_to_vmem [thread:$0]  %s129_s19, 16, %s131_s21, [#allocation15]  }
  0x11   :  { %s54_s11 = sshll.u32 %s2975_s2, 4  ;;  %s2822_s27 = smov [#allocation2]   ;;  %s55_s11 = int_to_ptr.hbm [resolvable:$true] %s54_s11 }
  0x12   :  { %s35_s28 = sshll.u32 %s2822_s27, 4  ;;  %s2823_s29 = smov [#allocation7]   ;;  %s36_s28 = int_to_ptr.vmem [resolvable:$true] %s35_s28 }
  0x13   :  { %38 = dma.hbm_to_vmem [thread:$0]  %s34_s24, 448, %s36_s28, [#allocation3]  }
  0x14   :  { %s56_s30 = sshll.u32 %s2823_s29, 4  ;;  %s84_s4 = sshll.u32 %s2979_s6, 4  ;;  %s57_s30 = int_to_ptr.vmem [resolvable:$true] %s56_s30  ;;  %s85_s4 = int_to_ptr.hbm [resolvable:$true] %s84_s4 }
  0x15   :  { %62 = dma.hbm_to_vmem [thread:$0]  %s55_s11, 7168, %s57_s30, [#allocation6], %s2818_s1, %s2818_s1, %s2819_s16  }
  0x16   :  { %s2824_s0 = smov [#allocation10]   ;;  %s114_s8 = sshll.u32 %s2983_s10, 4  ;;  %s115_s8 = int_to_ptr.hbm [resolvable:$true] %s114_s8 }
  0x17   :  { %s86_s19 = sshll.u32 %s2824_s0, 4  ;;  %s2825_s21 = smov 128   ;;  %s87_s19 = int_to_ptr.vmem [resolvable:$true] %s86_s19 }
  0x18   :  { %s2826_s22 = smov 8   ;;  %s2827_s23 = smov [#allocation13]  }
  0x19   :  { %92 = dma.hbm_to_vmem [thread:$0]  %s85_s4, 2048, %s87_s19, [#allocation9], %s2825_s21, %s2825_s21, %s2826_s22  }
  0x1a   :  { %s116_s24 = sshll.u32 %s2827_s23, 4  ;;  %s138_s26 = sshll.u32 %s2985_s12, 4  ;;  %s117_s24 = int_to_ptr.vmem [resolvable:$true] %s116_s24  ;;  %s139_s26 = int_to_ptr.hbm [resolvable:$true] %s138_s26 }
  0x1b   :  { %122 = dma.hbm_to_vmem [thread:$0]  %s115_s8, 1024, %s117_s24, [#allocation12], %s2818_s1, %s2818_s1, %s2819_s16  }
  0x1c   :  { %s2828_s11 = smov [#allocation16]   ;;  %s2829_s10 = smov 448  }
  0x1d   :  { %s140_s27 = sshll.u32 %s2828_s11, 4  ;;  %s2830_s28 = smov 28   ;;  %s141_s27 = int_to_ptr.vmem [resolvable:$true] %s140_s27 }
  0x1e   :  { %146 = dma.hbm_to_vmem [thread:$0]  %s139_s26, 7168, %s141_s27, [#allocation15], %s2829_s10, %s2829_s10, %s2830_s28  }
  0x1f   :  { %2802 = dma.done.wait [#allocation3], 448  }
  0x20   :  { %2803 = vsyncadd [#allocation3], 4294966848 }
  0x21   :  { %2804 = dma.done.wait [#allocation6], 7296  }
  0x22   :  { %2805 = vsyncadd [#allocation6], 4294960000 }
  0x23   :  { %2806 = dma.done.wait [#allocation9], 3072  }
  0x24   :  { %2807 = vsyncadd [#allocation9], 4294964224 }
  0x25   :  { %2808 = dma.done.wait [#allocation12], 2048  }
  0x26   :  { %2809 = vsyncadd [#allocation12], 4294965248 }
  0x27   :  { %2810 = dma.done.wait [#allocation15], 7184  }
  0x28   :  { %2811 = vsyncadd [#allocation15], 4294960112  ;;  %v2330_v0 = vld [vmem:[#allocation7 + $0x38] sm:$0xff]  ;;  %v2329_v3 = vld [vmem:[#allocation7 + $0x30] sm:$0xff]  ;;  %s1696_s0 = sshll.u32 %s2988_s15, 4  ;;  %s1685_s21 = sshll.u32 %s2987_s14, 4  ;;  %s1697_s0 = int_to_ptr.hbm [resolvable:$true] %s1696_s0  ;;  %s1686_s21 = int_to_ptr.hbm [resolvable:$true] %s1685_s21 }
  0x29   :  { %v2338_v1 = vld [vmem:[#allocation7 + $0x78] sm:$0xff]  ;;  %667 = vmatpush.bf16.msra.mxu0 %v2330_v0  ;;  %v2337_v4 = vld [vmem:[#allocation7 + $0x70] sm:$0xff]  ;;  %v2328_v7 = vld [vmem:[#allocation7 + $0x28] sm:$0xff] }
  0x2a   :  { %v2346_v2 = vld [vmem:[#allocation7 + $0xb8] sm:$0xff]  ;;  %680 = vmatpush.bf16.msra.mxu1 %v2338_v1  ;;  %v2345_v5 = vld [vmem:[#allocation7 + $0xb0] sm:$0xff]  ;;  %v2336_v8 = vld [vmem:[#allocation7 + $0x68] sm:$0xff] }
  0x2b   :  { %693 = vmatpush.bf16.msra.mxu2 %v2346_v2  ;;  %v2354_v6 = vld [vmem:[#allocation7 + $0xf8] sm:$0xff]  ;;  %v2344_v9 = vld [vmem:[#allocation7 + $0xa8] sm:$0xff]  ;;  %v2353_v10 = vld [vmem:[#allocation7 + $0xf0] sm:$0xff] }
  0x2c   :  { %706 = vmatpush.bf16.msra.mxu3 %v2354_v6  ;;  %v2327_v11 = vld [vmem:[#allocation7 + $0x20] sm:$0xff]  ;;  %v2352_v14 = vld [vmem:[#allocation7 + $0xe8] sm:$0xff]  ;;  %v2326_v15 = vld [vmem:[#allocation7 + $0x18] sm:$0xff] }
  0x2d   :  { %668 = vmatpush.bf16.msra.mxu0 %v2329_v3  ;;  %v2335_v12 = vld [vmem:[#allocation7 + $0x60] sm:$0xff]  ;;  %v2334_v16 = vld [vmem:[#allocation7 + $0x58] sm:$0xff]  ;;  %v2325_v19 = vld [vmem:[#allocation7 + $0x10] sm:$0xff] }
  0x2e   :  { %681 = vmatpush.bf16.msra.mxu1 %v2337_v4  ;;  %v2343_v13 = vld [vmem:[#allocation7 + $0xa0] sm:$0xff]  ;;  %v2342_v17 = vld [vmem:[#allocation7 + $0x98] sm:$0xff]  ;;  %v2333_v20 = vld [vmem:[#allocation7 + $0x50] sm:$0xff] }
  0x2f   :  { %694 = vmatpush.bf16.msra.mxu2 %v2345_v5  ;;  %v2351_v18 = vld [vmem:[#allocation7 + $0xe0] sm:$0xff]  ;;  %v2341_v21 = vld [vmem:[#allocation7 + $0x90] sm:$0xff]  ;;  %v2350_v22 = vld [vmem:[#allocation7 + $0xd8] sm:$0xff] }
  0x30   :  { %707 = vmatpush.bf16.msra.mxu3 %v2353_v10  ;;  %v2324_v23 = vld [vmem:[#allocation7 + $0x8] sm:$0xff]  ;;  %v185_v25 = vld [vmem:[#allocation2] sm:$0xff]  ;;  %v2349_v27 = vld [vmem:[#allocation7 + $0xd0] sm:$0xff] }
  0x31   :  { %669 = vmatpush.bf16.msra.mxu0 %v2328_v7  ;;  %v2332_v24 = vld [vmem:[#allocation7 + $0x48] sm:$0xff]  ;;  %v310_v29 = vunpack.c.l.b16 %v185_v25  ;;  %v2323_v30 = vld [vmem:[#allocation7] sm:$0xff]  ;;  %v311_v33 = vunpack.c.h.b16 %v185_v25  ;;  %v2362_v35 = vld [vmem:[#allocation7 + $0x138] sm:$0xff] }
  0x32   :  { %682 = vmatpush.bf16.msra.mxu1 %v2336_v8  ;;  %v2340_v26 = vld [vmem:[#allocation7 + $0x88] sm:$0xff]  ;;  %v2331_v31 = vld [vmem:[#allocation7 + $0x40] sm:$0xff]  ;;  %v2370_v36 = vld [vmem:[#allocation7 + $0x178] sm:$0xff] }
  0x33   :  { %695 = vmatpush.bf16.msra.mxu2 %v2344_v9  ;;  %v186_v28 = vld [vmem:[#allocation2 + $0x8] sm:$0xff]  ;;  %v2378_v37 = vld [vmem:[#allocation7 + $0x1b8] sm:$0xff]  ;;  %v317_v38 = vpack.c.b16 %v310_v29, %v310_v29  ;;  %v318_v41 = vpack.c.b16 %v311_v33, %v311_v33  ;;  %v2361_v42 = vld [vmem:[#allocation7 + $0x130] sm:$0xff] }
  0x34   :  { %708 = vmatpush.bf16.msra.mxu3 %v2352_v14  ;;  %v312_v32 = vunpack.c.l.b16 %v186_v28  ;;  %v2339_v34 = vld [vmem:[#allocation7 + $0x80] sm:$0xff]  ;;  %v2348_v39 = vld [vmem:[#allocation7 + $0xc8] sm:$0xff]  ;;  %v2369_v43 = vld [vmem:[#allocation7 + $0x170] sm:$0xff]  ;;  %v313_v46 = vunpack.c.h.b16 %v186_v28 }
  0x35   :  { %670 = vmatpush.bf16.msra.mxu0 %v2327_v11  ;;  %v2377_v44 = vld [vmem:[#allocation7 + $0x1b0] sm:$0xff]  ;;  %v2347_v45 = vld [vmem:[#allocation7 + $0xc0] sm:$0xff]  ;;  %v2360_v47 = vld [vmem:[#allocation7 + $0x128] sm:$0xff] }
  0x36   :  { %683 = vmatpush.bf16.msra.mxu1 %v2335_v12  ;;  %v319_v40 = vpack.c.b16 %v312_v32, %v312_v32  ;;  %v2368_v48 = vld [vmem:[#allocation7 + $0x168] sm:$0xff]  ;;  %v320_v50 = vpack.c.b16 %v313_v46, %v313_v46  ;;  %v2359_v51 = vld [vmem:[#allocation7 + $0x120] sm:$0xff]  ;;  %v2358_v54 = vld [vmem:[#allocation7 + $0x118] sm:$0xff] }
  0x37   :  { %696 = vmatpush.bf16.msra.mxu2 %v2343_v13  ;;  %v2376_v49 = vld [vmem:[#allocation7 + $0x1a8] sm:$0xff]  ;;  %v2367_v52 = vld [vmem:[#allocation7 + $0x160] sm:$0xff]  ;;  %v2366_v55 = vld [vmem:[#allocation7 + $0x158] sm:$0xff] }
  0x38   :  { %709 = vmatpush.bf16.msra.mxu3 %v2351_v18  ;;  %v2375_v53 = vld [vmem:[#allocation7 + $0x1a0] sm:$0xff]  ;;  %v2374_v56 = vld [vmem:[#allocation7 + $0x198] sm:$0xff]  ;;  %v2357_v57 = vld [vmem:[#allocation7 + $0x110] sm:$0xff] }
  0x39   :  { %671 = vmatpush.bf16.msra.mxu0 %v2326_v15  ;;  %v2365_v58 = vld [vmem:[#allocation7 + $0x150] sm:$0xff]  ;;  %v2356_v60 = vld [vmem:[#allocation7 + $0x108] sm:$0xff]  ;;  %v2355_v2 = vld [vmem:[#allocation7 + $0x100] sm:$0xff] }
  0x3a   :  { %684 = vmatpush.bf16.msra.mxu1 %v2334_v16  ;;  %v2373_v59 = vld [vmem:[#allocation7 + $0x190] sm:$0xff]  ;;  %v2364_v62 = vld [vmem:[#allocation7 + $0x148] sm:$0xff]  ;;  %v2363_v5 = vld [vmem:[#allocation7 + $0x140] sm:$0xff] }
  0x3b   :  { %697 = vmatpush.bf16.msra.mxu2 %v2342_v17  ;;  %v187_v61 = vld [vmem:[#allocation2 + $0x10] sm:$0xff]  ;;  %v188_v0 = vld [vmem:[#allocation2 + $0x18] sm:$0xf]  ;;  %v2371_v6 = vld [vmem:[#allocation7 + $0x180] sm:$0xff] }
  0x3c   :  { %710 = vmatpush.bf16.msra.mxu3 %v2350_v22  ;;  %v2372_v63 = vld [vmem:[#allocation7 + $0x188] sm:$0xff]  ;;  %v314_v1 = vunpack.c.l.b16 %v187_v61  ;;  %v315_v3 = vunpack.c.h.b16 %v187_v61  ;;  %v316_v4 = vunpack.c.l.b16 %v188_v0  ;;  %v2386_v10 = vld [vmem:[#allocation8 + $0x38] sm:$0xff]  ;;  %v2385_v11 = vld [vmem:[#allocation8 + $0x30] sm:$0xff] }
  0x3d   :  { %672 = vmatpush.bf16.msra.mxu0 %v2325_v19  ;;  %v2384_v12 = vld [vmem:[#allocation8 + $0x28] sm:$0xff]  ;;  %v2383_v13 = vld [vmem:[#allocation8 + $0x20] sm:$0xff]  ;;  %v2382_v14 = vld [vmem:[#allocation8 + $0x18] sm:$0xff] }
  0x3e   :  { %685 = vmatpush.bf16.msra.mxu1 %v2333_v20  ;;  %v321_v7 = vpack.c.b16 %v314_v1, %v314_v1  ;;  %v322_v8 = vpack.c.b16 %v315_v3, %v315_v3  ;;  %v323_v9 = vpack.c.b16 %v316_v4, %v316_v4  ;;  %v2381_v17 = vld [vmem:[#allocation8 + $0x10] sm:$0xff]  ;;  %v2380_v19 = vld [vmem:[#allocation8 + $0x8] sm:$0xff]  ;;  %v2379_v22 = vld [vmem:[#allocation8] sm:$0xff] }
  0x3f   :  { %698 = vmatpush.bf16.msra.mxu2 %v2341_v21  ;;  %v2031_v46 = vld [vmem:[#allocation10 + $0x78] sm:$0xf0]  ;;  %v2396_v61 = vld [vmem:[#allocation10 + $0x44] sm:$0xf0]  ;;  %v2007_v0 = vld [vmem:[#allocation10 + $0x48] sm:$0xf0] }
  0x40   :  { %711 = vmatpush.bf16.msra.mxu3 %v2349_v27  ;;  %v2394_v3 = vld [vmem:[#allocation10 + $0x34] sm:$0xf0]  ;;  %v2393_v4 = vld [vmem:[#allocation10 + $0x34] sm:$0xf] }
  0x41   :  { %673 = vmatpush.bf16.msra.mxu0 %v2324_v23  ;;  %v2492_v23 = vld [vmem:[%s2976_s3] ss:$0 sm:$0xff] }
  0x42   :  { %686 = vmatpush.bf16.msra.mxu1 %v2332_v24 }
  0x43   :  { %699 = vmatpush.bf16.msra.mxu2 %v2340_v26 }
  0x44   :  { %712 = vmatpush.bf16.msra.mxu3 %v2348_v39 }
  0x45   :  { %674 = vmatpush.bf16.msra.mxu0 %v2323_v30 }
  0x46   :  { %687 = vmatpush.bf16.msra.mxu1 %v2331_v31 }
  0x47   :  { %700 = vmatpush.bf16.msra.mxu2 %v2339_v34 }
  0x48   :  { %675 = vmatmul.bf16.vlgmr.msra.gmra.mxu0 %v317_v38  ;;  %713 = vmatpush.bf16.msra.mxu3 %v2347_v45 }
  0x49   :  { %719 = vmatpush.bf16.msrb.mxu0 %v2362_v35  ;;  %688 = vmatmul.bf16.vlgmr.msra.gmra.mxu1 %v318_v41 }
  0x4a   :  { %732 = vmatpush.bf16.msrb.mxu1 %v2370_v36  ;;  %701 = vmatmul.bf16.vlgmr.msra.gmra.mxu2 %v319_v40 }
  0x4b   :  { %745 = vmatpush.bf16.msrb.mxu2 %v2378_v37  ;;  %714 = vmatmul.bf16.vlgmr.msra.gmra.mxu3 %v320_v50  ;;  %v2399_v50 = vld [vmem:[#allocation10 + $0x64] sm:$0xf] }
  0x4c   :  { %828 = vmatpush.bf16.msrb.mxu3 %v2386_v10  ;;  %v2391_v10 = vld [vmem:[#allocation10 + $0x24] sm:$0xf] }
  0x4d   :  { %720 = vmatpush.bf16.msrb.mxu0 %v2361_v42  ;;  %v2029_v42 = vld [vmem:[#allocation10 + $0x70] sm:$0xf] }
  0x4e   :  { %733 = vmatpush.bf16.msrb.mxu1 %v2369_v43  ;;  %v2402_v43 = vld [vmem:[#allocation10 + $0x74] sm:$0xf0] }
  0x4f   :  { %746 = vmatpush.bf16.msrb.mxu2 %v2377_v44  ;;  %v2401_v44 = vld [vmem:[#allocation10 + $0x74] sm:$0xf]  ;;  %v2030_v45 = vor.u32 %v2402_v43, %v2029_v42 }
  0x50   :  { %829 = vmatpush.bf16.msrb.mxu3 %v2385_v11 }
  0x51   :  { %721 = vmatpush.bf16.msrb.mxu0 %v2360_v47  ;;  %v2034_v47 = vor.u32 %v2401_v44, %v2031_v46 }
  0x52   :  { %734 = vmatpush.bf16.msrb.mxu1 %v2368_v48  ;;  %v2021_v48 = vld [vmem:[#allocation10 + $0x60] sm:$0xf] }
  0x53   :  { %747 = vmatpush.bf16.msrb.mxu2 %v2376_v49  ;;  %v2400_v49 = vld [vmem:[#allocation10 + $0x64] sm:$0xf0] }
  0x54   :  { %830 = vmatpush.bf16.msrb.mxu3 %v2384_v12  ;;  %v1991_v12 = vld [vmem:[#allocation10 + $0x28] sm:$0xf0] }
  0x55   :  { %722 = vmatpush.bf16.msrb.mxu0 %v2359_v51  ;;  %v2022_v51 = vor.u32 %v2400_v49, %v2021_v48  ;;  %v2407_v48 = vld [vmem:[#allocation11 + $0x20] sm:$0xff]  ;;  %v2406_v49 = vld [vmem:[#allocation11 + $0x18] sm:$0xff] }
  0x56   :  { %735 = vmatpush.bf16.msrb.mxu1 %v2367_v52  ;;  %v2023_v52 = vld [vmem:[#allocation10 + $0x68] sm:$0xf0] }
  0x57   :  { %748 = vmatpush.bf16.msrb.mxu2 %v2375_v53  ;;  %v2026_v53 = vor.u32 %v2399_v50, %v2023_v52  ;;  %v2405_v50 = vld [vmem:[#allocation11 + $0x10] sm:$0xff]  ;;  %v2403_v52 = vld [vmem:[#allocation11] sm:$0xff] }
  0x58   :  { %831 = vmatpush.bf16.msrb.mxu3 %v2383_v13  ;;  %v1994_v13 = vor.u32 %v2391_v10, %v1991_v12  ;;  %v2413_v12 = vld [vmem:[#allocation13 + $0x10] sm:$0xff] }
  0x59   :  { %723 = vmatpush.bf16.msrb.mxu0 %v2358_v54  ;;  %v2013_v54 = vld [vmem:[#allocation10 + $0x50] sm:$0xf] }
  0x5a   :  { %736 = vmatpush.bf16.msrb.mxu1 %v2366_v55  ;;  %v2398_v55 = vld [vmem:[#allocation10 + $0x54] sm:$0xf0] }
  0x5b   :  { %749 = vmatpush.bf16.msrb.mxu2 %v2374_v56  ;;  %v2397_v56 = vld [vmem:[#allocation10 + $0x54] sm:$0xf] }
  0x5c   :  { %832 = vmatpush.bf16.msrb.mxu3 %v2382_v14  ;;  %v1981_v14 = vld [vmem:[#allocation10 + $0x10] sm:$0xf] }
  0x5d   :  { %724 = vmatpush.bf16.msrb.mxu0 %v2357_v57  ;;  %v2014_v57 = vor.u32 %v2398_v55, %v2013_v54  ;;  %v873_v54 = vld [vmem:[%s2980_s7] sm:$0x3]  ;;  %v2417_v55 = vld [vmem:[#allocation13 + $0x30] sm:$0xff] }
  0x5e   :  { %737 = vmatpush.bf16.msrb.mxu1 %v2365_v58  ;;  %v2015_v58 = vld [vmem:[#allocation10 + $0x58] sm:$0xf0] }
  0x5f   :  { %750 = vmatpush.bf16.msrb.mxu2 %v2373_v59  ;;  %v2018_v59 = vor.u32 %v2397_v56, %v2015_v58  ;;  %v875_v56 = vperm.slane %v873_v54, 0  ;;  %v2416_v58 = vld [vmem:[#allocation13 + $0x28] sm:$0xff] }
  0x60   :  { %833 = vmatpush.bf16.msrb.mxu3 %v2381_v17 }
  0x61   :  { %725 = vmatpush.bf16.msrb.mxu0 %v2356_v60  ;;  %v2005_v60 = vld [vmem:[#allocation10 + $0x40] sm:$0xf] }
  0x62   :  { %738 = vmatpush.bf16.msrb.mxu1 %v2364_v62  ;;  %v2395_v62 = vld [vmem:[#allocation10 + $0x44] sm:$0xf] }
  0x63   :  { %751 = vmatpush.bf16.msrb.mxu2 %v2372_v63  ;;  %v2006_v63 = vor.u32 %v2396_v61, %v2005_v60  ;;  %v2010_v1 = vor.u32 %v2395_v62, %v2007_v0 }
  0x64   :  { %834 = vmatpush.bf16.msrb.mxu3 %v2380_v19 }
  0x65   :  { %726 = vmatpush.bf16.msrb.mxu0 %v2355_v2  ;;  %v1997_v2 = vld [vmem:[#allocation10 + $0x30] sm:$0xf] }
  0x66   :  { %739 = vmatpush.bf16.msrb.mxu1 %v2363_v5  ;;  %v1998_v5 = vor.u32 %v2394_v3, %v1997_v2  ;;  %v2414_v2 = vld [vmem:[#allocation13 + $0x18] sm:$0xff] }
  0x67   :  { %752 = vmatpush.bf16.msrb.mxu2 %v2371_v6  ;;  %v1999_v6 = vld [vmem:[#allocation10 + $0x38] sm:$0xf0] }
  0x68   :  { %727 = vmatmul.bf16.vlgmr.msrb.gmra.mxu0 %v321_v7  ;;  %835 = vmatpush.bf16.msrb.mxu3 %v2379_v22  ;;  %v2002_v7 = vor.u32 %v2393_v4, %v1999_v6  ;;  %v2387_v22 = vld [vmem:[#allocation10 + $0x4] sm:$0xf] }
  0x69   :  { %740 = vmatmul.bf16.vlgmr.msrb.gmra.mxu1 %v322_v8  ;;  %959 = vmatpush.bf16.msra.mxu0 %v2030_v45  ;;  %v1989_v8 = vld [vmem:[#allocation10 + $0x20] sm:$0xf] }
  0x6a   :  { %753 = vmatmul.bf16.vlgmr.msrb.gmra.mxu2 %v323_v9  ;;  %972 = vmatpush.bf16.msra.mxu1 %v2034_v47  ;;  %v2392_v9 = vld [vmem:[#allocation10 + $0x24] sm:$0xf0] }
  0x6b   :  { %v1990_v11 = vor.u32 %v2392_v9, %v1989_v8  ;;  %v2408_v47 = vld [vmem:[#allocation11 + $0x28] sm:$0xff] }
  0x6d   :  { %960 = vmatpush.bf16.msra.mxu0 %v2022_v51  ;;  %v2404_v51 = vld [vmem:[#allocation11 + $0x8] sm:$0xff] }
  0x6e   :  { %973 = vmatpush.bf16.msra.mxu1 %v2026_v53  ;;  %v2418_v53 = vld [vmem:[#allocation13 + $0x38] sm:$0xff] }
  0x6f   :  { %1144 = vmatpush.bf16.msra.mxu3 %v2418_v53  ;;  %v2221_v53 = vld [vmem:[#allocation16 + $0xe8] sm:$0xf] }
  0x71   :  { %961 = vmatpush.bf16.msra.mxu0 %v2014_v57  ;;  %v876_v57 = vperm.slane %v873_v54, 1  ;;  %v2451_v54 = vld [vmem:[#allocation16 + $0x100] sm:$0xf0] }
  0x72   :  { %974 = vmatpush.bf16.msra.mxu1 %v2018_v59 }
  0x73   :  { %1145 = vmatpush.bf16.msra.mxu3 %v2417_v55 }
  0x75   :  { %962 = vmatpush.bf16.msra.mxu0 %v2006_v63  ;;  %v2415_v63 = vld [vmem:[#allocation13 + $0x20] sm:$0xff] }
  0x76   :  { %975 = vmatpush.bf16.msra.mxu1 %v2010_v1 }
  0x77   :  { %1146 = vmatpush.bf16.msra.mxu3 %v2416_v58  ;;  %v2307_v58 = vld [vmem:[#allocation16 + $0x1ac] sm:$0xf0] }
  0x79   :  { %963 = vmatpush.bf16.msra.mxu0 %v1998_v5 }
  0x7a   :  { %976 = vmatpush.bf16.msra.mxu1 %v2002_v7  ;;  %v189_v7 = vld [vmem:[#allocation5] sm:$0xff] }
  0x7b   :  { %1147 = vmatpush.bf16.msra.mxu3 %v2415_v63 }
  0x7d   :  { %964 = vmatpush.bf16.msra.mxu0 %v1990_v11 }
  0x7e   :  { %977 = vmatpush.bf16.msra.mxu1 %v1994_v13  ;;  %v2412_v13 = vld [vmem:[#allocation13 + $0x8] sm:$0xff] }
  0x7f   :  { %1148 = vmatpush.bf16.msra.mxu3 %v2414_v2  ;;  %v2444_v2 = vld [vmem:[#allocation16 + $0xc8] sm:$0xf0] }
  0x83   :  { %1149 = vmatpush.bf16.msra.mxu3 %v2413_v12  ;;  %v2159_v12 = vld [vmem:[#allocation16 + $0x8c] sm:$0xf0] }
  0x87   :  { %1150 = vmatpush.bf16.msra.mxu3 %v2412_v13  ;;  %v2165_v13 = vld [vmem:[#allocation16 + $0x78] sm:$0xf] }
  0xc5   :  { %v676_v15 = vpop.f32.mrf.mxu0 }
  0xc6   :  { %v689_v16 = vpop.f32.mrf.mxu1  ;;  %v677_v26 = vadd.f32 %v2492_v23, %v676_v15  ;;  %v2390_v15 = vld [vmem:[#allocation10 + $0x14] sm:$0xf0] }
  0xc7   :  { %v1982_v17 = vor.u32 %v2390_v15, %v1981_v14  ;;  %v2411_v14 = vld [vmem:[#allocation13] sm:$0xff]  ;;  %v2297_v15 = vld [vmem:[#allocation16 + $0x188] sm:$0xf] }
  0xc8   :  { %v690_v27 = vadd.f32 %v689_v16, %v677_v26  ;;  %v2389_v16 = vld [vmem:[#allocation10 + $0x14] sm:$0xf]  ;;  %v2493_v26 = vld [vmem:[%s2978_s5] ss:$0 sm:$0xff]  ;;  %1151 = vmatpush.bf16.msra.mxu3 %v2411_v14 }
  0xc9   :  { %965 = vmatpush.bf16.msra.mxu0 %v1982_v17  ;;  %v2468_v17 = vld [vmem:[#allocation16 + $0x18c] sm:$0xf]  ;;  %v2437_v14 = vld [vmem:[#allocation16 + $0x90] sm:$0xf0] }
  0xcd   :  { %v702_v18 = vpop.f32.mrf.mxu2  ;;  %v678_v20 = vpop.f32.mrf.mxu0 }
  0xce   :  { %v691_v21 = vpop.f32.mrf.mxu1  ;;  %v715_v24 = vpop.f32.mrf.mxu3  ;;  %v703_v29 = vadd.f32 %v702_v18, %v690_v27  ;;  %v1983_v18 = vld [vmem:[#allocation10 + $0x18] sm:$0xf0]  ;;  %v1973_v20 = vld [vmem:[#allocation10] sm:$0xf] }
  0xcf   :  { %v1986_v19 = vor.u32 %v2389_v16, %v1983_v18  ;;  %v2388_v21 = vld [vmem:[#allocation10 + $0x4] sm:$0xf0] }
  0xd0   :  { %v716_v30 = vadd.f32 %v715_v24, %v703_v29  ;;  %v1974_v23 = vor.u32 %v2388_v21, %v1973_v20  ;;  %v1975_v24 = vld [vmem:[#allocation10 + $0x8] sm:$0xf0]  ;;  %v2471_v16 = vld [vmem:[#allocation16 + $0x1a0] sm:$0xf0]  ;;  %v2305_v20 = vld [vmem:[#allocation16 + $0x190] sm:$0xf] }
  0xd1   :  { %978 = vmatpush.bf16.msra.mxu1 %v1986_v19  ;;  %v2298_v18 = vor.u32 %v2471_v16, %v2297_v15  ;;  %v2299_v19 = vld [vmem:[#allocation16 + $0x1a4] sm:$0xf0]  ;;  %v2472_v21 = vld [vmem:[#allocation16 + $0x1a8] sm:$0xf0]  ;;  %v2166_v16 = vor.u32 %v2437_v14, %v2165_v13 }
  0xd2   :  { %966 = vmatpush.bf16.msra.mxu0 %v1974_v23  ;;  %v2306_v23 = vor.u32 %v2472_v21, %v2305_v20  ;;  %v2129_v20 = vld [vmem:[#allocation16 + $0x38] sm:$0xf]  ;;  %v2429_v21 = vld [vmem:[#allocation16 + $0x50] sm:$0xf0]  ;;  %v2420_v13 = vld [vmem:[#allocation16 + $0xc] sm:$0xf] }
  0xd3   :  { %v2111_v14 = vld [vmem:[#allocation16 + $0x24] sm:$0xf0] }
  0xd5   :  { %v704_v25 = vpop.f32.mrf.mxu2 }
  0xd6   :  { %v717_v28 = vpop.f32.mrf.mxu3  ;;  %v1978_v25 = vor.u32 %v2387_v22, %v1975_v24  ;;  %v2302_v22 = vor.u32 %v2468_v17, %v2299_v19  ;;  %v2269_v24 = vld [vmem:[#allocation16 + $0x150] sm:$0xf]  ;;  %1541 = vmatpush.bf16.msrb.mxu0 %v2298_v18  ;;  %v2455_v17 = vld [vmem:[#allocation16 + $0x124] sm:$0xf]  ;;  %v2251_v18 = vld [vmem:[#allocation16 + $0x13c] sm:$0xf0] }
  0xd7   :  { %v2410_v28 = vld [vmem:[#allocation11 + $0x38] sm:$0xff]  ;;  %v2254_v19 = vor.u32 %v2455_v17, %v2251_v18  ;;  %v2452_v17 = vld [vmem:[#allocation16 + $0x108] sm:$0xf0] }
  0xd8   :  { %979 = vmatpush.bf16.msra.mxu1 %v1978_v25  ;;  %1061 = vmatpush.bf16.msra.mxu2 %v2410_v28  ;;  %v2464_v25 = vld [vmem:[#allocation16 + $0x168] sm:$0xf0]  ;;  %v2271_v28 = vld [vmem:[#allocation16 + $0x16c] sm:$0xf0]  ;;  %v2449_v18 = vld [vmem:[#allocation16 + $0xf4] sm:$0xf] }
  0xdc   :  { %1554 = vmatpush.bf16.msrb.mxu1 %v2302_v22  ;;  %v2426_v22 = vld [vmem:[#allocation16 + $0x3c] sm:$0xf] }
  0xe5   :  { %v728_v31 = vpop.f32.mrf.mxu0 }
  0xe6   :  { %v741_v32 = vpop.f32.mrf.mxu1  ;;  %v729_v33 = vadd.f32 %v728_v31, %v716_v30  ;;  %v2409_v30 = vld [vmem:[#allocation11 + $0x30] sm:$0xff] }
  0xe7   :  { %1062 = vmatpush.bf16.msra.mxu2 %v2409_v30  ;;  %v2465_v30 = vld [vmem:[#allocation16 + $0x170] sm:$0xf0] }
  0xe8   :  { %v742_v34 = vadd.f32 %v741_v32, %v729_v33 }
  0xeb   :  { %1063 = vmatpush.bf16.msra.mxu2 %v2408_v47 }
  0xed   :  { %v754_v35 = vpop.f32.mrf.mxu2  ;;  %v730_v37 = vpop.f32.mrf.mxu0 }
  0xee   :  { %v755_v36 = vadd.f32 %v754_v35, %v742_v34  ;;  %v743_v38 = vpop.f32.mrf.mxu1 }
  0xef   :  { %1064 = vmatpush.bf16.msra.mxu2 %v2407_v48  ;;  %v2213_v48 = vld [vmem:[#allocation16 + $0xe0] sm:$0xf] }
  0xf0   :  { %2496 = vtanh.f32 %v755_v36 }
  0xf3   :  { %1065 = vmatpush.bf16.msra.mxu2 %v2406_v49  ;;  %v2450_v49 = vld [vmem:[#allocation16 + $0xf8] sm:$0xf0] }
  0xf5   :  { %v756_v39 = vpop.f32.mrf.mxu2 }
  0xf6   :  { %v2497_v40 = vpop.eup %2496 }
  0xf7   :  { %v759_v41 = vpack.c.bf16 %v2497_v40, %v2497_v40  ;;  %1066 = vmatpush.bf16.msra.mxu2 %v2405_v50  ;;  %v2447_v50 = vld [vmem:[#allocation16 + $0xe4] sm:$0xf] }
  0xf9   :  { %836 = vmatmul.bf16.vlgmr.msrb.gmra.mxu3 %v759_v41 }
  0xfb   :  { %1067 = vmatpush.bf16.msra.mxu2 %v2404_v51  ;;  %v2214_v51 = vor.u32 %v2450_v49, %v2213_v48 }
  0xff   :  { %1068 = vmatpush.bf16.msra.mxu2 %v2403_v52  ;;  %v2215_v52 = vld [vmem:[#allocation16 + $0xfc] sm:$0xf0] }
 0x100   :  { %v2218_v55 = vor.u32 %v2447_v50, %v2215_v52  ;;  %v2321_v50 = vld [vmem:[#allocation16 + $0x1a0] sm:$0xf] }
 0x103   :  { %1567 = vmatpush.bf16.msrb.mxu2 %v2306_v23  ;;  %v2130_v23 = vor.u32 %v2429_v21, %v2129_v20 }
 0x17c   :  { %v837_v27 = vpop.f32.mrf.mxu3 }
 0x17d   :  { %v838_v29 = vadd.f32 %v2493_v26, %v837_v27  ;;  %v2461_v26 = vld [vmem:[#allocation16 + $0x154] sm:$0xf]  ;;  %v2270_v27 = vor.u32 %v2464_v25, %v2269_v24  ;;  %v2131_v24 = vld [vmem:[#allocation16 + $0x54] sm:$0xf0]  ;;  %v2137_v25 = vld [vmem:[#allocation16 + $0x40] sm:$0xf] }
 0x17f   :  { %v842_v31 = vand.u32 2147483647, %v838_v29  ;;  %v841_v43 = vmax.f32 %v838_v29, 0.0  ;;  %v2277_v29 = vld [vmem:[#allocation16 + $0x158] sm:$0xf]  ;;  %1542 = vmatpush.bf16.msrb.mxu0 %v2270_v27  ;;  %v2134_v27 = vor.u32 %v2426_v22, %v2131_v24 }
 0x180   :  { %v2237_v22 = vld [vmem:[#allocation16 + $0xf8] sm:$0xf]  ;;  %v2495_v24 = vld [vmem:[#allocation14] ss:$0 sm:$0xff] }
 0x181   :  { %v843_v32 = vsub.f32 0.0, %v842_v31  ;;  %v2274_v31 = vor.u32 %v2461_v26, %v2271_v28  ;;  %v2430_v26 = vld [vmem:[#allocation16 + $0x58] sm:$0xf0] }
 0x182   :  { %v2138_v28 = vor.u32 %v2430_v26, %v2137_v25  ;;  %v2201_v26 = vld [vmem:[#allocation16 + $0xb8] sm:$0xf] }
 0x183   :  { %v844_v33 = vmul.f32 1.442695, %v843_v32  ;;  %v2278_v32 = vor.u32 %v2465_v30, %v2277_v29  ;;  %1555 = vmatpush.bf16.msrb.mxu1 %v2274_v31  ;;  %v2448_v29 = vld [vmem:[#allocation16 + $0xec] sm:$0xf]  ;;  %v2223_v30 = vld [vmem:[#allocation16 + $0x104] sm:$0xf0] }
 0x184   :  { %v839_v34 = vpop.f32.mrf.mxu3  ;;  %v2226_v31 = vor.u32 %v2448_v29, %v2223_v30 }
 0x185   :  { %2498 = vpow2.f32 %v844_v33  ;;  %v2241_v33 = vld [vmem:[#allocation16 + $0x118] sm:$0xf]  ;;  %v2457_v34 = vld [vmem:[#allocation16 + $0x130] sm:$0xf0]  ;;  %1568 = vmatpush.bf16.msrb.mxu2 %v2278_v32  ;;  %v2101_v32 = vld [vmem:[#allocation16] sm:$0xf] }
 0x18b   :  { %v2499_v35 = vpop.eup %2498 }
 0x18c   :  { %v846_v36 = vadd.f32 1.0, %v2499_v35  ;;  %v849_v37 = vmul.f32 -0.5, %v2499_v35  ;;  %v852_v39 = vand.u32 2147483647, %v2499_v35 }
 0x18e   :  { %2500 = vlog2.f32 %v846_v36  ;;  %v850_v38 = vadd.f32 1.0, %v849_v37  ;;  %vm853_vm0 = vcmp.lt.f32.partialorder %v852_v39, 0.0004427343  ;;  %v2243_v36 = vld [vmem:[#allocation16 + $0x134] sm:$0xf0]  ;;  %v2242_v39 = vor.u32 %v2457_v34, %v2241_v33 }
 0x18f   :  { %v2249_v37 = vld [vmem:[#allocation16 + $0x120] sm:$0xf]  ;;  %v2422_v33 = vld [vmem:[#allocation16 + $0x18] sm:$0xf0]  ;;  %v2419_v34 = vld [vmem:[#allocation16 + $0x4] sm:$0xf] }
 0x190   :  { %v851_v42 = vmul.f32 %v2499_v35, %v850_v38  ;;  %v2454_v35 = vld [vmem:[#allocation16 + $0x11c] sm:$0xf]  ;;  %1543 = vmatpush.bf16.msrb.mxu0 %v2242_v39 }
 0x191   :  { %v2458_v38 = vld [vmem:[#allocation16 + $0x138] sm:$0xf0] }
 0x194   :  { %v2501_v40 = vpop.eup %2500  ;;  %1544 = vmatpush.bf16.msrb.mxu0 %v2214_v51  ;;  %v2474_v51 = vld [vmem:[#allocation16 + $0x1b8] sm:$0xf0] }
 0x195   :  { %v848_v41 = vmul.f32 0.6931472, %v2501_v40  ;;  %v2246_v40 = vor.u32 %v2454_v35, %v2243_v36  ;;  %v2102_v35 = vor.u32 %v2422_v33, %v2101_v32  ;;  %v2103_v36 = vld [vmem:[#allocation16 + $0x1c] sm:$0xf0]  ;;  %v2322_v52 = vor.u32 %v2474_v51, %v2321_v50  ;;  %v2446_v33 = vld [vmem:[#allocation16 + $0xd8] sm:$0xf0] }
 0x196   :  { %v2106_v39 = vor.u32 %v2419_v34, %v2103_v36  ;;  %v2209_v32 = vld [vmem:[#allocation16 + $0xc0] sm:$0xf]  ;;  %v2147_v50 = vld [vmem:[#allocation16 + $0x64] sm:$0xf0] }
 0x197   :  { %v854_v44 = vsel %vm853_vm0, %v851_v42, %v848_v41  ;;  %v2250_v41 = vor.u32 %v2458_v38, %v2249_v37  ;;  %1556 = vmatpush.bf16.msrb.mxu1 %v2246_v40  ;;  %v2494_v42 = vld [vmem:[%s2982_s9] ss:$0 sm:$0xff]  ;;  %v2109_v37 = vld [vmem:[#allocation16 + $0x8] sm:$0xf]  ;;  %v2423_v38 = vld [vmem:[#allocation16 + $0x20] sm:$0xf0]  ;;  %v2210_v36 = vor.u32 %v2446_v33, %v2209_v32 }
 0x198   :  { %v855_v45 = vadd.f32 %v854_v44, %v841_v43  ;;  %v2110_v40 = vor.u32 %v2423_v38, %v2109_v37  ;;  %v2173_v37 = vld [vmem:[#allocation16 + $0x80] sm:$0xf]  ;;  %v2438_v38 = vld [vmem:[#allocation16 + $0x98] sm:$0xf0]  ;;  %s2831_s9 = smov [#allocation18]  }
 0x199   :  { %1569 = vmatpush.bf16.msrb.mxu2 %v2250_v41  ;;  %v2441_v41 = vld [vmem:[#allocation16 + $0xb4] sm:$0xf]  ;;  %s1694_s17 = sshll.u32 %s2831_s9, 4  ;;  %s1695_s17 = int_to_ptr.vmem [resolvable:$true] %s1694_s17 }
 0x19a   :  { %v856_v46 = vpack.c.bf16 %v855_v45, %v855_v45 }
 0x19b   :  { %1557 = vmatpush.bf16.msrb.mxu1 %v2218_v55  ;;  %v2285_v55 = vld [vmem:[#allocation16 + $0x160] sm:$0xf] }
 0x19c   :  { %967 = vmatmul.bf16.vlgmr.msra.gmra.mxu0 %v856_v46  ;;  %980 = vmatmul.bf16.vlgmr.msra.gmra.mxu1 %v856_v46 }
 0x219   :  { %v968_v59 = vpop.f32.mrf.mxu0  ;;  %v981_v60 = vpop.f32.mrf.mxu1 }
 0x21a   :  { %v969_v61 = vadd.f32 %v968_v59, %v875_v56  ;;  %v982_v62 = vadd.f32 %v981_v60, %v876_v57  ;;  %v2222_v56 = vor.u32 %v2451_v54, %v2221_v53  ;;  %v2469_v57 = vld [vmem:[#allocation16 + $0x194] sm:$0xf]  ;;  %v2185_v60 = vld [vmem:[#allocation16 + $0xa8] sm:$0xf]  ;;  %v2434_v53 = vld [vmem:[#allocation16 + $0x7c] sm:$0xf] }
 0x21b   :  { %v2310_v59 = vor.u32 %v2469_v57, %v2307_v58  ;;  %v2167_v54 = vld [vmem:[#allocation16 + $0x94] sm:$0xf0]  ;;  %v2466_v57 = vld [vmem:[#allocation16 + $0x178] sm:$0xf0]  ;;  %v2463_v58 = vld [vmem:[#allocation16 + $0x164] sm:$0xf] }
 0x21c   :  { %1676 = vst [vmem:[#allocation18 + $0x8] sm:$0xff] %v969_v61  ;;  %v985_v0 = vmax.f32 %v982_v62, -4.5  ;;  %1570 = vmatpush.bf16.msrb.mxu2 %v2222_v56  ;;  %v2440_v62 = vld [vmem:[#allocation16 + $0xac] sm:$0xf]  ;;  %v2170_v56 = vor.u32 %v2434_v53, %v2167_v54 }
 0x21d   :  { %1580 = vmatpush.bf16.msrb.mxu3 %v2310_v59  ;;  %v2287_v59 = vld [vmem:[#allocation16 + $0x17c] sm:$0xf0]  ;;  %v2432_v53 = vld [vmem:[#allocation16 + $0x68] sm:$0xf0] }
 0x21e   :  { %v986_v1 = vmin.f32 %v985_v0, 0.0  ;;  %v2187_v0 = vld [vmem:[#allocation16 + $0xc4] sm:$0xf0] }
 0x220   :  { %v987_v3 = vmul.f32 0.5, %v986_v1  ;;  %1677 = vst [vmem:[#allocation18 + $0x10] sm:$0xff] %v986_v1  ;;  %v2193_v1 = vld [vmem:[#allocation16 + $0xb0] sm:$0xf] }
 0x221   :  { %v970_v4 = vpop.f32.mrf.mxu0  ;;  %v983_v5 = vpop.f32.mrf.mxu1 }
 0x222   :  { %v988_v6 = vmul.f32 1.442695, %v987_v3  ;;  %v2190_v3 = vor.u32 %v2440_v62, %v2187_v0  ;;  %v2194_v4 = vor.u32 %v2444_v2, %v2193_v1  ;;  %v2462_v5 = vld [vmem:[#allocation16 + $0x15c] sm:$0xf]  ;;  %v2293_v62 = vld [vmem:[#allocation16 + $0x168] sm:$0xf] }
 0x223   :  { %v2427_v1 = vld [vmem:[#allocation16 + $0x44] sm:$0xf]  ;;  %v2139_v2 = vld [vmem:[#allocation16 + $0x5c] sm:$0xf0] }
 0x224   :  { %2502 = vpow2.f32 %v988_v6  ;;  %v2279_v6 = vld [vmem:[#allocation16 + $0x174] sm:$0xf0]  ;;  %1558 = vmatpush.bf16.msrb.mxu1 %v2190_v3  ;;  %1571 = vmatpush.bf16.msrb.mxu2 %v2194_v4  ;;  %v2257_v3 = vld [vmem:[#allocation16 + $0x128] sm:$0xf]  ;;  %v2142_v4 = vor.u32 %v2427_v1, %v2139_v2 }
 0x228   :  { %1572 = vmatpush.bf16.msrb.mxu2 %v2166_v16  ;;  %v2114_v16 = vor.u32 %v2420_v13, %v2111_v14 }
 0x22a   :  { %v2503_v8 = vpop.eup %2502 }
 0x22b   :  { %v990_v9 = vmul.f32 %v2503_v8, %v189_v7  ;;  %v2282_v7 = vor.u32 %v2462_v5, %v2279_v6  ;;  %v2157_v8 = vld [vmem:[#allocation16 + $0x70] sm:$0xf]  ;;  %v2459_v5 = vld [vmem:[#allocation16 + $0x140] sm:$0xf0]  ;;  %v2456_v6 = vld [vmem:[#allocation16 + $0x12c] sm:$0xf] }
 0x22c   :  { %1573 = vmatpush.bf16.msrb.mxu2 %v2138_v28  ;;  %v2442_v28 = vld [vmem:[#allocation16 + $0xbc] sm:$0xf] }
 0x22d   :  { %v991_v10 = vadd.f32 %v990_v9, %v969_v61  ;;  %v2443_v61 = vld [vmem:[#allocation16 + $0xc0] sm:$0xf0]  ;;  %v2436_v9 = vld [vmem:[#allocation16 + $0x88] sm:$0xf0]  ;;  %1581 = vmatpush.bf16.msrb.mxu3 %v2282_v7  ;;  %v2259_v7 = vld [vmem:[#allocation16 + $0x144] sm:$0xf0] }
 0x22e   :  { %v2186_v63 = vor.u32 %v2443_v61, %v2185_v60  ;;  %v2286_v60 = vor.u32 %v2466_v57, %v2285_v55  ;;  %v2290_v61 = vor.u32 %v2463_v58, %v2287_v59  ;;  %v2117_v57 = vld [vmem:[#allocation16 + $0x10] sm:$0xf] }
 0x22f   :  { %v992_v11 = vpack.c.bf16 %v991_v10, %v991_v10  ;;  %1675 = vst [vmem:[#allocation18] sm:$0xff] %v991_v10  ;;  %v2433_v10 = vld [vmem:[#allocation16 + $0x74] sm:$0xf] }
 0x230   :  { %1545 = vmatpush.bf16.msrb.mxu0 %v2186_v63  ;;  %v2162_v15 = vor.u32 %v2433_v10, %v2159_v12  ;;  %1574 = vmatpush.bf16.msrb.mxu2 %v2110_v40  ;;  %v2467_v63 = vld [vmem:[#allocation16 + $0x180] sm:$0xf0]  ;;  %v2265_v10 = vld [vmem:[#allocation16 + $0x130] sm:$0xf]  ;;  %v2175_v40 = vld [vmem:[#allocation16 + $0x9c] sm:$0xf0] }
 0x231   :  { %1069 = vmatmul.bf16.vlgmr.msra.gmra.mxu2 %v992_v11  ;;  %v2158_v11 = vor.u32 %v2436_v9, %v2157_v8  ;;  %1582 = vmatpush.bf16.msrb.mxu3 %v2254_v19  ;;  %v2294_v0 = vor.u32 %v2467_v63, %v2293_v62  ;;  %v2258_v8 = vor.u32 %v2459_v5, %v2257_v3  ;;  %v2231_v19 = vld [vmem:[#allocation16 + $0x10c] sm:$0xf0]  ;;  %v2125_v63 = vld [vmem:[#allocation16 + $0x18] sm:$0xf]  ;;  %1699 = dma.vmem_to_hbm [thread:$0]  %s1695_s17, 384, %s1697_s0, [#allocation19]  }
 0x232   :  { %1559 = vmatpush.bf16.msrb.mxu1 %v2162_v15  ;;  %v2262_v9 = vor.u32 %v2456_v6, %v2259_v7  ;;  %v2229_v15 = vld [vmem:[#allocation16 + $0xf0] sm:$0xf]  ;;  %v2234_v21 = vor.u32 %v2449_v18, %v2231_v19 }
 0x233   :  { %v2230_v20 = vor.u32 %v2452_v17, %v2229_v15  ;;  %v2119_v62 = vld [vmem:[#allocation16 + $0x2c] sm:$0xf0] }
 0x234   :  { %1546 = vmatpush.bf16.msrb.mxu0 %v2158_v11  ;;  %1619 = vmatpush.bf16.msra.mxu2 %v2322_v52  ;;  %v2460_v11 = vld [vmem:[#allocation16 + $0x148] sm:$0xf0]  ;;  %v2153_v52 = vld [vmem:[#allocation16 + $0x50] sm:$0xf] }
 0x235   :  { %1583 = vmatpush.bf16.msrb.mxu3 %v2226_v31  ;;  %v2266_v12 = vor.u32 %v2460_v11, %v2265_v10  ;;  %v2203_v31 = vld [vmem:[#allocation16 + $0xd4] sm:$0xf0]  ;;  %v2154_v59 = vor.u32 %v2432_v53, %v2153_v52 }
 0x236   :  { %1560 = vmatpush.bf16.msrb.mxu1 %v2134_v27  ;;  %v2445_v27 = vld [vmem:[#allocation16 + $0xd0] sm:$0xf0] }
 0x237   :  { %v2202_v30 = vor.u32 %v2445_v27, %v2201_v26 }
 0x238   :  { %1547 = vmatpush.bf16.msrb.mxu0 %v2130_v23  ;;  %1620 = vmatpush.bf16.msra.mxu2 %v2294_v0  ;;  %v2453_v23 = vld [vmem:[#allocation16 + $0x110] sm:$0xf0] }
 0x239   :  { %v2238_v25 = vor.u32 %v2453_v23, %v2237_v22  ;;  %v2425_v0 = vld [vmem:[#allocation16 + $0x30] sm:$0xf0] }
 0x23a   :  { %1561 = vmatpush.bf16.msrb.mxu1 %v2106_v39  ;;  %v2435_v39 = vld [vmem:[#allocation16 + $0x84] sm:$0xf]  ;;  %v2126_v3 = vor.u32 %v2425_v0, %v2125_v63 }
 0x23c   :  { %1548 = vmatpush.bf16.msrb.mxu0 %v2102_v35  ;;  %1621 = vmatpush.bf16.msra.mxu2 %v2266_v12  ;;  %v2206_v35 = vor.u32 %v2442_v28, %v2203_v31 }
 0x240   :  { %1622 = vmatpush.bf16.msra.mxu2 %v2238_v25 }
 0x244   :  { %1623 = vmatpush.bf16.msra.mxu2 %v2210_v36 }
 0x2b4   :  { %v1070_v43 = vpop.f32.mrf.mxu2 }
 0x2b5   :  { %v1071_v44 = vadd.f32 %v2494_v42, %v1070_v43  ;;  %v2195_v42 = vld [vmem:[#allocation16 + $0xcc] sm:$0xf0]  ;;  %v2313_v43 = vld [vmem:[#allocation16 + $0x198] sm:$0xf] }
 0x2b7   :  { %2504 = vtanh.f32 %v1071_v44  ;;  %v2198_v44 = vor.u32 %v2441_v41, %v2195_v42  ;;  %v2181_v41 = vld [vmem:[#allocation16 + $0x88] sm:$0xf]  ;;  %v2439_v42 = vld [vmem:[#allocation16 + $0xa0] sm:$0xf0] }
 0x2b9   :  { %1584 = vmatpush.bf16.msrb.mxu3 %v2198_v44  ;;  %v2174_v44 = vor.u32 %v2438_v38, %v2173_v37 }
 0x2bc   :  { %v1072_v45 = vpop.f32.mrf.mxu2 }
 0x2bd   :  { %v2505_v46 = vpop.eup %2504  ;;  %v2473_v45 = vld [vmem:[#allocation16 + $0x1b0] sm:$0xf0]  ;;  %1585 = vmatpush.bf16.msrb.mxu3 %v2170_v56 }
 0x2be   :  { %v1075_v47 = vpack.c.bf16 %v2505_v46, %v2505_v46  ;;  %v2470_v46 = vld [vmem:[#allocation16 + $0x19c] sm:$0xf]  ;;  %v2314_v48 = vor.u32 %v2473_v45, %v2313_v43  ;;  %v2178_v45 = vor.u32 %v2435_v39, %v2175_v40 }
 0x2c0   :  { %1152 = vmatmul.bf16.vlgmr.msra.gmra.mxu3 %v1075_v47  ;;  %v2315_v47 = vld [vmem:[#allocation16 + $0x1b4] sm:$0xf0]  ;;  %1593 = vmatpush.bf16.msra.mxu0 %v2314_v48  ;;  %v2431_v48 = vld [vmem:[#allocation16 + $0x60] sm:$0xf0] }
 0x2c1   :  { %v2318_v49 = vor.u32 %v2470_v46, %v2315_v47  ;;  %1586 = vmatpush.bf16.msrb.mxu3 %v2142_v4  ;;  %v2145_v46 = vld [vmem:[#allocation16 + $0x48] sm:$0xf]  ;;  %v2182_v47 = vor.u32 %v2439_v42, %v2181_v41 }
 0x2c2   :  { %v2146_v55 = vor.u32 %v2431_v48, %v2145_v46 }
 0x2c3   :  { %1606 = vmatpush.bf16.msra.mxu1 %v2318_v49  ;;  %v2428_v49 = vld [vmem:[#allocation16 + $0x4c] sm:$0xf]  ;;  %1624 = vmatpush.bf16.msra.mxu2 %v2182_v47 }
 0x2c4   :  { %1594 = vmatpush.bf16.msra.mxu0 %v2286_v60  ;;  %v2150_v56 = vor.u32 %v2428_v49, %v2147_v50  ;;  %v2424_v60 = vld [vmem:[#allocation16 + $0x28] sm:$0xf0] }
 0x2c5   :  { %1587 = vmatpush.bf16.msrb.mxu3 %v2114_v16  ;;  %v2118_v1 = vor.u32 %v2424_v60, %v2117_v57  ;;  %v1237_v16 = vld [vmem:[%s2986_s13] sm:$0xff]  ;;  %s2832_s13 = smov [#allocation17]  }
 0x2c6   :  { %v1239_v17 = vperm.slane %v1237_v16, 0  ;;  %v1240_v18 = vperm.slane %v1237_v16, 1  ;;  %v1241_v25 = vperm.slane %v1237_v16, 2  ;;  %v1242_v26 = vperm.slane %v1237_v16, 3  ;;  %s1683_s15 = sshll.u32 %s2832_s13, 4  ;;  %s1684_s15 = int_to_ptr.vmem [resolvable:$true] %s1683_s15 }
 0x2c7   :  { %1607 = vmatpush.bf16.msra.mxu1 %v2290_v61  ;;  %v2421_v61 = vld [vmem:[#allocation16 + $0x14] sm:$0xf]  ;;  %1625 = vmatpush.bf16.msra.mxu2 %v2154_v59  ;;  %v1243_v40 = vperm.slane %v1237_v16, 4  ;;  %v1244_v41 = vperm.slane %v1237_v16, 5 }
 0x2c8   :  { %1595 = vmatpush.bf16.msra.mxu0 %v2258_v8  ;;  %v2122_v2 = vor.u32 %v2421_v61, %v2119_v62 }
 0x2cb   :  { %1608 = vmatpush.bf16.msra.mxu1 %v2262_v9  ;;  %1626 = vmatpush.bf16.msra.mxu2 %v2126_v3 }
 0x2cc   :  { %1596 = vmatpush.bf16.msra.mxu0 %v2230_v20 }
 0x2cf   :  { %1609 = vmatpush.bf16.msra.mxu1 %v2234_v21 }
 0x2d0   :  { %1597 = vmatpush.bf16.msra.mxu0 %v2202_v30 }
 0x2d3   :  { %1610 = vmatpush.bf16.msra.mxu1 %v2206_v35 }
 0x2d4   :  { %1598 = vmatpush.bf16.msra.mxu0 %v2174_v44 }
 0x2d7   :  { %1611 = vmatpush.bf16.msra.mxu1 %v2178_v45 }
 0x2d8   :  { %1599 = vmatpush.bf16.msra.mxu0 %v2146_v55 }
 0x2db   :  { %1612 = vmatpush.bf16.msra.mxu1 %v2150_v56 }
 0x2dc   :  { %1600 = vmatpush.bf16.msra.mxu0 %v2118_v1 }
 0x2df   :  { %1613 = vmatpush.bf16.msra.mxu1 %v2122_v2 }
 0x343   :  { %v1153_v29 = vpop.f32.mrf.mxu3 }
 0x344   :  { %v1154_v34 = vadd.f32 %v2495_v24, %v1153_v29 }
 0x346   :  { %v1158_v43 = vand.u32 2147483647, %v1154_v34  ;;  %v1157_v12 = vmax.f32 %v1154_v34, 0.0 }
 0x348   :  { %v1159_v51 = vsub.f32 0.0, %v1158_v43 }
 0x34a   :  { %v1160_v54 = vmul.f32 1.442695, %v1159_v51 }
 0x34b   :  { %v1155_v58 = vpop.f32.mrf.mxu3 }
 0x34c   :  { %2506 = vpow2.f32 %v1160_v54  ;;  %v1245_v54 = vperm.slane %v1237_v16, 6 }
 0x352   :  { %v2507_v4 = vpop.eup %2506 }
 0x353   :  { %v1162_v5 = vadd.f32 1.0, %v2507_v4  ;;  %v1165_v6 = vmul.f32 -0.5, %v2507_v4  ;;  %v1168_v8 = vand.u32 2147483647, %v2507_v4 }
 0x355   :  { %2508 = vlog2.f32 %v1162_v5  ;;  %v1166_v7 = vadd.f32 1.0, %v1165_v6  ;;  %vm1169_vm1 = vcmp.lt.f32.partialorder %v1168_v8, 0.0004427343 }
 0x357   :  { %v1167_v11 = vmul.f32 %v2507_v4, %v1166_v7 }
 0x35b   :  { %v2509_v9 = vpop.eup %2508 }
 0x35c   :  { %v1164_v10 = vmul.f32 0.6931472, %v2509_v9 }
 0x35e   :  { %v1170_v13 = vsel %vm1169_vm1, %v1167_v11, %v1164_v10 }
 0x35f   :  { %v1171_v14 = vadd.f32 %v1170_v13, %v1157_v12 }
 0x361   :  { %v1172_v15 = vpack.c.bf16 %v1171_v14, %v1171_v14 }
 0x363   :  { %1549 = vmatmul.bf16.vlgmr.msrb.gmra.mxu0 %v1172_v15  ;;  %1562 = vmatmul.bf16.vlgmr.msrb.gmra.mxu1 %v1172_v15 }
 0x364   :  { %1575 = vmatmul.bf16.vlgmr.msrb.gmra.mxu2 %v1172_v15  ;;  %1588 = vmatmul.bf16.vlgmr.msrb.gmra.mxu3 %v1172_v15 }
 0x373   :  { %1601 = vmatmul.bf16.vlgmr.msra.gmra.mxu0 %v1172_v15  ;;  %1614 = vmatmul.bf16.vlgmr.msra.gmra.mxu1 %v1172_v15 }
 0x374   :  { %1627 = vmatmul.bf16.vlgmr.msra.gmra.mxu2 %v1172_v15 }
 0x3e0   :  { %v1550_v19 = vpop.f32.mrf.mxu0  ;;  %v1563_v20 = vpop.f32.mrf.mxu1 }
 0x3e1   :  { %v1551_v21 = vadd.f32 %v1550_v19, %v1239_v17  ;;  %v1564_v22 = vadd.f32 %v1563_v20, %v1240_v18 }
 0x3e3   :  { %v1632_v23 = vsub.f32 0.0, %v1551_v21  ;;  %v1633_v24 = vsub.f32 0.0, %v1564_v22 }
 0x3e5   :  { %v1639_v27 = vmul.f32 1.442695, %v1632_v23  ;;  %v1641_v28 = vmul.f32 1.442695, %v1633_v24 }
 0x3e7   :  { %2510 = vpow2.f32 %v1639_v27  ;;  %v1576_v29 = vpop.f32.mrf.mxu2  ;;  %v1589_v30 = vpop.f32.mrf.mxu3 }
 0x3e8   :  { %2512 = vpow2.f32 %v1641_v28  ;;  %v1577_v31 = vadd.f32 %v1576_v29, %v1241_v25  ;;  %v1590_v32 = vadd.f32 %v1589_v30, %v1242_v26  ;;  %v1552_v33 = vpop.f32.mrf.mxu0  ;;  %v1565_v34 = vpop.f32.mrf.mxu1 }
 0x3ea   :  { %v1634_v35 = vsub.f32 0.0, %v1577_v31  ;;  %v1635_v36 = vsub.f32 0.0, %v1590_v32 }
 0x3ec   :  { %v1643_v37 = vmul.f32 1.442695, %v1634_v35  ;;  %v1645_v38 = vmul.f32 1.442695, %v1635_v36 }
 0x3ed   :  { %v2511_v39 = vpop.eup %2510 }
 0x3ee   :  { %v2513_v42 = vpop.eup %2512  ;;  %v1653_v43 = vadd.f32 1.0, %v2511_v39  ;;  %2514 = vpow2.f32 %v1643_v37 }
 0x3ef   :  { %v1654_v44 = vadd.f32 1.0, %v2513_v42  ;;  %2516 = vpow2.f32 %v1645_v38  ;;  %v1578_v45 = vpop.f32.mrf.mxu2  ;;  %v1591_v46 = vpop.f32.mrf.mxu3 }
 0x3f0   :  { %2518 = vrcp.f32 %v1653_v43  ;;  %v1602_v47 = vpop.f32.mrf.mxu0  ;;  %v1615_v48 = vpop.f32.mrf.mxu1 }
 0x3f1   :  { %2520 = vrcp.f32 %v1654_v44  ;;  %v1603_v49 = vadd.f32 %v1602_v47, %v1243_v40  ;;  %v1616_v50 = vadd.f32 %v1615_v48, %v1244_v41 }
 0x3f3   :  { %v1636_v51 = vsub.f32 0.0, %v1603_v49  ;;  %v1637_v52 = vsub.f32 0.0, %v1616_v50 }
 0x3f4   :  { %v2515_v53 = vpop.eup %2514 }
 0x3f5   :  { %v2517_v55 = vpop.eup %2516  ;;  %v1655_v56 = vadd.f32 1.0, %v2515_v53  ;;  %v1647_v57 = vmul.f32 1.442695, %v1636_v51  ;;  %v1649_v60 = vmul.f32 1.442695, %v1637_v52 }
 0x3f6   :  { %v2519_v58 = vpop.eup %2518  ;;  %v1656_v59 = vadd.f32 1.0, %v2517_v55 }
 0x3f7   :  { %v2521_v61 = vpop.eup %2520  ;;  %2522 = vrcp.f32 %v1655_v56  ;;  %v1628_v62 = vpop.f32.mrf.mxu2 }
 0x3f8   :  { %v1667_v63 = vpack.c.bf16 %v2521_v61, %v2519_v58  ;;  %2524 = vrcp.f32 %v1656_v59  ;;  %v1629_v0 = vadd.f32 %v1628_v62, %v1245_v54  ;;  %v1604_v1 = vpop.f32.mrf.mxu0  ;;  %v1617_v2 = vpop.f32.mrf.mxu1 }
 0x3f9   :  { %2526 = vpow2.f32 %v1647_v57 }
 0x3fa   :  { %1671 = vst [vmem:[#allocation17] sm:$0xff] %v1667_v63  ;;  %2528 = vpow2.f32 %v1649_v60  ;;  %v1638_v3 = vsub.f32 0.0, %v1629_v0 }
 0x3fc   :  { %v1651_v4 = vmul.f32 1.442695, %v1638_v3 }
 0x3fd   :  { %v2523_v5 = vpop.eup %2522 }
 0x3fe   :  { %v2525_v6 = vpop.eup %2524  ;;  %2530 = vpow2.f32 %v1651_v4 }
 0x3ff   :  { %v2527_v7 = vpop.eup %2526  ;;  %v1668_v8 = vpack.c.bf16 %v2525_v6, %v2523_v5  ;;  %v1630_v9 = vpop.f32.mrf.mxu2 }
 0x400   :  { %v2529_v10 = vpop.eup %2528  ;;  %v1657_v11 = vadd.f32 1.0, %v2527_v7 }
 0x401   :  { %1672 = vst [vmem:[#allocation17 + $0x8] sm:$0xff] %v1668_v8  ;;  %v1658_v12 = vadd.f32 1.0, %v2529_v10 }
 0x402   :  { %2532 = vrcp.f32 %v1657_v11 }
 0x403   :  { %2534 = vrcp.f32 %v1658_v12 }
 0x404   :  { %v2531_v13 = vpop.eup %2530 }
 0x405   :  { %v1659_v14 = vadd.f32 1.0, %v2531_v13 }
 0x407   :  { %2536 = vrcp.f32 %v1659_v14 }
 0x408   :  { %v2533_v15 = vpop.eup %2532 }
 0x409   :  { %v2535_v16 = vpop.eup %2534 }
 0x40a   :  { %v1669_v17 = vpack.c.bf16 %v2535_v16, %v2533_v15 }
 0x40c   :  { %1673 = vst [vmem:[#allocation17 + $0x10] sm:$0xff] %v1669_v17 }
 0x40d   :  { %v2537_v18 = vpop.eup %2536 }
 0x40e   :  { %v1670_v19 = vpack.c.bf16 %v2537_v18, %v2537_v18 }
 0x410   :  { %1674 = vst [vmem:[#allocation17 + $0x18] sm:$0xf] %v1670_v19 }
 0x411   :  { %1688 = dma.vmem_to_hbm [thread:$0]  %s1684_s15, 448, %s1686_s21, [#allocation4]  }
 0x412   :  { %2812 = dma.done.wait [#allocation4], 448  }
 0x413   :  { %2813 = vsyncadd [#allocation4], 4294966848 }
 0x414   :  { %2814 = dma.done.wait [#allocation19], 384  }
 0x415   :  { %2815 = vsyncadd [#allocation19], 4294966912 }
 0x416   :  { %1708 = vsyncpa [#allocation3], 1 }
 0x417   :  { %1709 = vsyncpa [#allocation6], 1 }
 0x418   :  { %1710 = vsyncpa [#allocation9], 1 }
 0x419   :  { %1711 = vsyncpa [#allocation12], 1 }
 0x41a   :  { %1712 = vsyncpa [#allocation15], 1 }
 0x41b   :  { %1713 = vsyncpa [#allocation4], 1 }
 0x41c   :  { %1714 = vsyncpa [#allocation19], 1 }

</bundles_post_ra>
